<compile_context>
chip_gen: v7x
topology: tpu7x:2x2x1
jax: 0.10.0
libtpu: 0.0.40
codegen_flags: <defaults>
</compile_context>

<pallas_src>
import numpy as np

import jax
import jax.numpy as jnp
from jax.experimental import pallas as pl
from jax.experimental.pallas import tpu as pltpu


# ----------------------------- helpers --------------------------------------


def _round_up(x, m):
    return (x + m - 1) // m * m


def _pick_batch_fold(N, L, max_lanes=4096):
    """Largest B dividing N with B*L <= max_lanes and >= 2 grid steps left."""
    best = 1
    for b in range(1, N + 1):
        if N % b == 0 and b * L <= max_lanes and N // b >= min(2, N):
            best = b
    return best


def _tap_masks(H, W):
    """(9, H*W) float32 masks implementing SAME zero padding per 3x3 tap."""
    h = np.arange(H * W) // W
    w = np.arange(H * W) % W
    masks = np.zeros((9, H * W), np.float32)
    for dh in range(3):
        for dw in range(3):
            valid = ((h + dh - 1 >= 0) & (h + dh - 1 < H)
                     & (w + dw - 1 >= 0) & (w + dw - 1 < W))
            masks[dh * 3 + dw] = valid
    return jnp.asarray(masks)


# ----------------------------- fused Pallas kernel --------------------------


def _make_fused_kernel(ch_in, H, W, B, align):
    L = H * W
    Lb = B * L
    c1, c2 = 2 * ch_in, 4 * ch_in
    A_x = _round_up(ch_in, align)
    A_1 = _round_up(c1, align)
    A_2 = _round_up(c2, align)
    Kx, K1 = 9 * A_x, 9 * A_1
    off1, off2 = Kx, Kx + K1
    f32 = jnp.float32
    sdt = jnp.bfloat16          # scratch / matmul operand storage dtype

    def im2col_store(src, A, base, p_ref, masks_ref):
        """Write the 9-tap im2col of `src` (C_s, Lb) f32 into scratch rows
        [base, base + 9*A). Source rows are zero-padded to A once so every
        tap store is a full, sublane-aligned (A, Lb) slab."""
        C_s = src.shape[0]
        if A > C_s:
            src = jnp.concatenate(
                [src, jnp.zeros((A - C_s, Lb), f32)], axis=0)
        for dh in range(3):
            for dw in range(3):
                t = dh * 3 + dw
                d = (dh - 1) * W + (dw - 1)
                if d == 0:
                    blk = src                                   # center tap: mask == 1
                else:
                    blk = (pltpu.roll(src, (-d) % Lb, axis=1)
                           * masks_ref[pl.ds(t, 1), :])
                p_ref[pl.ds(base + t * A, A), :] = blk.astype(sdt)

    def kernel(x_ref, masks_ref,
               w1_ref, b1_ref, w2_ref, b2_ref, w3_ref, b3_ref,
               wres_ref, bres_ref,
               o_ref, p_ref):
        xf = x_ref[0].astype(f32)                               # (ch_in, Lb)

        # Stage 1: out1 = relu(bn1(conv1(x)))   (Dropout == identity in eval)
        im2col_store(xf, A_x, 0, p_ref, masks_ref)
        out1 = jnp.maximum(
            jnp.dot(w1_ref[...], p_ref[pl.ds(0, Kx), :],
                    preferred_element_type=f32) + b1_ref[...], 0.0)

        # Stage 2: conv2(cat(x, out1)) -- ONE dot over the [x | out1] blocks
        im2col_store(out1, A_1, off1, p_ref, masks_ref)
        out2 = jnp.maximum(
            jnp.dot(w2_ref[...], p_ref[pl.ds(0, off2), :],
                    preferred_element_type=f32) + b2_ref[...], 0.0)

        # Stage 3: conv3(cat(out1, out2, x)) -- ONE dot over the full scratch
        im2col_store(out2, A_2, off2, p_ref, masks_ref)
        pre3 = jnp.dot(w3_ref[...], p_ref[...],
                       preferred_element_type=f32) + b3_ref[...]

        # Residual path last (short live range): x's center-tap rows hold x.
        res = jnp.dot(wres_ref[...], p_ref[pl.ds(4 * A_x, A_x), :],
                      preferred_element_type=f32) + bres_ref[...]

        o_ref[0] = (jnp.maximum(pre3, 0.0) + res).astype(o_ref.dtype)

    return kernel


# ----------------------------- parameter prep -------------------------------


def _fold_conv_block(w_hwio, scale, align, dtype):
    """(3,3,Cin,Cout) HWIO -> (Cout, 9*round_up(Cin, align)) matmul matrix.

    BN scale is folded in; columns are (tap, cin) with tap = dh*3 + dw and
    each tap's cin block zero-padded to `align` rows, matching the scratch.
    """
    kh, kw, cin, cout = w_hwio.shape
    A = _round_up(cin, align)
    wm = jnp.transpose(w_hwio, (3, 0, 1, 2)) * scale[:, None, None, None]
    wm = wm.reshape(cout, kh * kw, cin)
    if A > cin:
        wm = jnp.pad(wm, ((0, 0), (0, 0), (0, A - cin)))
    return wm.reshape(cout, kh * kw * A).astype(dtype)


def _prepare_kernel_params(params, ch_in, align, wdtype):
    c1, c2 = 2 * ch_in, 4 * ch_in
    A_x = _round_up(ch_in, align)
    w2, w3 = params["w2"], params["w3"]
    # conv2 input channels are cat(x, out1): scratch layout is [x | out1].
    w2m = jnp.concatenate([
        _fold_conv_block(w2[:, :, :ch_in, :], params["s2"], align, wdtype),
        _fold_conv_block(w2[:, :, ch_in:, :], params["s2"], align, wdtype),
    ], axis=1)
    # conv3 input channels are cat(out1, out2, x): reorder to [x | out1 | out2].
    w3m = jnp.concatenate([
        _fold_conv_block(w3[:, :, c1 + c2:, :], params["s3"], align, wdtype),     # x
        _fold_conv_block(w3[:, :, :c1, :], params["s3"], align, wdtype),          # out1
        _fold_conv_block(w3[:, :, c1:c1 + c2, :], params["s3"], align, wdtype),   # out2
    ], axis=1)
    wres = params["w1x1"].T * params["s_re"][:, None]                 # (ch_out, ch_in)
    wres = jnp.pad(wres, ((0, 0), (0, A_x - ch_in))).astype(wdtype)   # align to A_x
    return dict(
        w1m=_fold_conv_block(params["w1"], params["s1"], align, wdtype),
        b1=params["b1"].reshape(-1, 1),
        w2m=w2m, b2=params["b2"].reshape(-1, 1),
        w3m=w3m, b3=params["b3"].reshape(-1, 1),
        wres=wres, bres=params["b_re"].reshape(-1, 1),
    )


# ----------------------------- wrapper ---------------------------------------


@jax.jit
def redense_block_forward(x_nchw, params):
    """ReDense_block forward. x_nchw: (N, ch_in, H, W) -> (N, ch_out, H, W)."""
    N, ch_in, H, W = x_nchw.shape
    L = H * W
    c1, c2 = 2 * ch_in, 4 * ch_in

    wdtype = jnp.bfloat16
    align = 16 if wdtype == jnp.bfloat16 else 8       # bf16 memory tile is (16, 128)
    A_x = _round_up(ch_in, align)
    A_1 = _round_up(c1, align)
    A_2 = _round_up(c2, align)
    Kx, K1, K2 = 9 * A_x, 9 * A_1, 9 * A_2
    Ktot = Kx + K1 + K2

    B = _pick_batch_fold(N, L)                        # >=2 grid steps for v7x's 2 TCs
    G = N // B
    Lb = B * L

    kp = _prepare_kernel_params(params, ch_in, align, wdtype)
    ch_out = kp["wres"].shape[0]
    masks = jnp.tile(_tap_masks(H, W), (1, B))        # (9, B*L), per-image SAME masks

    # (N, C, H, W) -> (G, C, B*L); the transpose is a no-op bitcast when B == 1.
    x_fold = (x_nchw.reshape(G, B, ch_in, L)
              .transpose(0, 2, 1, 3)
              .reshape(G, ch_in, Lb))

    def const_spec(shape):
        return pl.BlockSpec(shape, lambda g: (0,) * len(shape))

    # Explicit VMEM limit from the actual footprint (double-buffered pipeline).
    f32b, bf16b = 4, 2
    scratch_bytes = Ktot * Lb * bf16b
    const_bytes = (9 * Lb * f32b
                   + (c1 * Kx + c2 * (Kx + K1) + ch_out * Ktot + ch_out * A_x) * bf16b
                   + (c1 + c2 + 2 * ch_out) * f32b)
    io_bytes = (ch_in + ch_out) * Lb * f32b
    live_bytes = (A_2 + c1 + c2 + 3 * ch_out) * Lb * f32b
    vmem_limit = int(min(100 << 20,
                         max(24 << 20,
                             2 * (scratch_bytes + 2 * (const_bytes + io_bytes)
                                  + live_bytes))))

    out_fold = pl.pallas_call(
        _make_fused_kernel(ch_in, H, W, B, align),
        out_shape=jax.ShapeDtypeStruct((G, ch_out, Lb), jnp.float32),
        grid_spec=pltpu.PrefetchScalarGridSpec(
            num_scalar_prefetch=0,
            grid=(G,),
            in_specs=[
                pl.BlockSpec((1, ch_in, Lb), lambda g: (g, 0, 0)),   # x
                const_spec((9, Lb)),                                  # pad masks
                const_spec((c1, Kx)), const_spec((c1, 1)),            # conv1
                const_spec((c2, Kx + K1)), const_spec((c2, 1)),       # conv2
                const_spec((ch_out, Ktot)), const_spec((ch_out, 1)),  # conv3
                const_spec((ch_out, A_x)), const_spec((ch_out, 1)),   # conv1x1 residual
            ],
            out_specs=pl.BlockSpec((1, ch_out, Lb), lambda g: (g, 0, 0)),
            scratch_shapes=[
                pltpu.VMEM((Ktot, Lb), wdtype),       # contiguous im2col [x|out1|out2]
            ],
        ),
        compiler_params=pltpu.CompilerParams(
            dimension_semantics=("parallel",),
            vmem_limit_bytes=vmem_limit,
        ),
    )(x_fold, masks,
      kp["w1m"], kp["b1"], kp["w2m"], kp["b2"], kp["w3m"], kp["b3"],
      kp["wres"], kp["bres"])

    # (G, ch_out, B*L) -> (N, ch_out, H, W); no-op transpose when B == 1.
    out = (out_fold.reshape(G, ch_out, B, L)
           .transpose(0, 2, 1, 3)
           .reshape(N, ch_out, H, W))
    return out


# ----------------------------- parameters -----------------------------------


def init_params(key, ch_in, ch_out, eps=1e-5):
    keys = iter(jax.random.split(key, 32))

    def conv_w(cin, cout):
        return jax.random.normal(next(keys), (3, 3, cin, cout), jnp.float32) * 0.1

    def conv_b(cout):
        return jax.random.normal(next(keys), (cout,), jnp.float32) * 0.1

    def bn(cout):
        gamma = jax.random.uniform(next(keys), (cout,), jnp.float32, 0.5, 1.5)
        beta = jax.random.normal(next(keys), (cout,), jnp.float32) * 0.1
        mean = jax.random.normal(next(keys), (cout,), jnp.float32) * 0.1
        var = jax.random.uniform(next(keys), (cout,), jnp.float32, 0.5, 1.5)
        return gamma, beta, mean, var

    def fold(conv_bias, bn_params):
        gamma, beta, mean, var = bn_params
        scale = gamma / jnp.sqrt(var + eps)
        bias = (conv_bias - mean) * scale + beta
        return scale, bias

    w1 = conv_w(ch_in, 2 * ch_in)
    s1, b1 = fold(conv_b(2 * ch_in), bn(2 * ch_in))
    w2 = conv_w(3 * ch_in, 4 * ch_in)
    s2, b2 = fold(conv_b(4 * ch_in), bn(4 * ch_in))
    w3 = conv_w(7 * ch_in, ch_out)
    s3, b3 = fold(conv_b(ch_out), bn(ch_out))
    w1x1 = jax.random.normal(next(keys), (ch_in, ch_out), jnp.float32) * 0.1
    s_re, b_re = fold(conv_b(ch_out), bn(ch_out))

    return dict(w1=w1, s1=s1, b1=b1, w2=w2, s2=s2, b2=b2,
                w3=w3, s3=s3, b3=b3, w1x1=w1x1, s_re=s_re, b_re=b_re)


# ----------------------------- pure-JAX reference ----------------------------


def reference_forward(x_nchw, params):
    x = jnp.transpose(x_nchw, (0, 2, 3, 1))

    def cbn(x, w, s, b, pad):
        y = jax.lax.conv_general_dilated(
            x, w, (1, 1), pad,
            dimension_numbers=("NHWC", "HWIO", "NHWC"),
            precision=jax.lax.Precision.HIGHEST)
        return y * s + b

    res = cbn(x, params["w1x1"][None, None], params["s_re"], params["b_re"], "VALID")
    out1 = jnp.maximum(cbn(x, params["w1"], params["s1"], params["b1"], "SAME"), 0.0)
    cat1 = jnp.concatenate([x, out1], axis=-1)
    out2 = jnp.maximum(cbn(cat1, params["w2"], params["s2"], params["b2"], "SAME"), 0.0)
    cat2 = jnp.concatenate([out1, out2, x], axis=-1)
    out = jnp.maximum(cbn(cat2, params["w3"], params["s3"], params["b3"], "SAME"), 0.0) + res
    return jnp.transpose(out, (0, 3, 1, 2))


if __name__ == "__main__":
    ch_in, ch_out = 4, 8
    N, H, W = 2, 16, 16

    key = jax.random.PRNGKey(0)
    k_x, k_p = jax.random.split(key)
    x = jax.random.normal(k_x, (N, ch_in, H, W), jnp.float32)  # NCHW, like PyTorch
    params = init_params(k_p, ch_in, ch_out)

    out = jax.block_until_ready(redense_block_forward(x, params))
    assert out.shape == (N, ch_out, H, W), out.shape

    ref = jax.block_until_ready(reference_forward(x, params))
    err = float(jnp.max(jnp.abs(out - ref)))
    # Tolerance relaxed for bf16 matmul-operand storage (f32 accumulation).
    assert err < 5e-2, f"max abs error too large: {err}"

    print("KERNEL_OK")
</pallas_src>

<mosaic_0001>
module attributes {stable_mosaic.version = 11 : i64} {
  func.func @kernel(%arg0: i32, %arg1: memref<1x4x256xf32, #tpu.memory_space<vmem>>, %arg2: memref<9x256xf32, #tpu.memory_space<vmem>>, %arg3: memref<8x144xbf16, #tpu.memory_space<vmem>>, %arg4: memref<8x1xf32, #tpu.memory_space<vmem>>, %arg5: memref<16x288xbf16, #tpu.memory_space<vmem>>, %arg6: memref<16x1xf32, #tpu.memory_space<vmem>>, %arg7: memref<8x432xbf16, #tpu.memory_space<vmem>>, %arg8: memref<8x1xf32, #tpu.memory_space<vmem>>, %arg9: memref<8x16xbf16, #tpu.memory_space<vmem>>, %arg10: memref<8x1xf32, #tpu.memory_space<vmem>>, %arg11: memref<1x8x256xf32, #tpu.memory_space<vmem>>, %arg12: memref<432x256xbf16, #tpu.memory_space<vmem>>) attributes {dimension_semantics = [#tpu.dimension_semantics<parallel>], iteration_bounds = array<i64: 2>, scalar_prefetch = 0 : i64, scratch_operands = 1 : i64, tpu.core_type = #tpu.core_type<tc>, window_params = [{transform_indices = @transform_0, window_bounds = array<i64: 1, 4, 256>}, {pipeline_mode = #tpu.pipeline_mode<synchronous>, transform_indices = @transform_1, window_bounds = array<i64: 9, 256>}, {pipeline_mode = #tpu.pipeline_mode<synchronous>, transform_indices = @transform_2, window_bounds = array<i64: 8, 144>}, {pipeline_mode = #tpu.pipeline_mode<synchronous>, transform_indices = @transform_3, window_bounds = array<i64: 8, 1>}, {pipeline_mode = #tpu.pipeline_mode<synchronous>, transform_indices = @transform_4, window_bounds = array<i64: 16, 288>}, {pipeline_mode = #tpu.pipeline_mode<synchronous>, transform_indices = @transform_5, window_bounds = array<i64: 16, 1>}, {pipeline_mode = #tpu.pipeline_mode<synchronous>, transform_indices = @transform_6, window_bounds = array<i64: 8, 432>}, {pipeline_mode = #tpu.pipeline_mode<synchronous>, transform_indices = @transform_7, window_bounds = array<i64: 8, 1>}, {pipeline_mode = #tpu.pipeline_mode<synchronous>, transform_indices = @transform_8, window_bounds = array<i64: 8, 16>}, {pipeline_mode = #tpu.pipeline_mode<synchronous>, transform_indices = @transform_9, window_bounds = array<i64: 8, 1>}, {transform_indices = @transform_10, window_bounds = array<i64: 1, 8, 256>}]} {
    %c0 = arith.constant 0 : index
    %c0_0 = arith.constant 0 : index
    %c0_1 = arith.constant 0 : index
    %0 = vector.load %arg1[%c0, %c0_0, %c0_1] : memref<1x4x256xf32, #tpu.memory_space<vmem>>, vector<1x4x256xf32>
    %1 = vector.shape_cast %0 : vector<1x4x256xf32> to vector<4x256xf32>
    %cst = arith.constant 0.000000e+00 : f32
    %2 = vector.broadcast %cst : f32 to vector<12x256xf32>
    %3 = tpu.concatenate %1, %2 in 0 : vector<4x256xf32>, vector<12x256xf32> -> vector<16x256xf32>
    %c17_i32 = arith.constant 17 : i32
    %4 = tpu.dynamic_rotate %3 by %c17_i32 dim 1 : vector<16x256xf32>, i32 -> vector<16x256xf32>
    %c0_2 = arith.constant 0 : index
    %c0_3 = arith.constant 0 : index
    %5 = vector.load %arg2[%c0_2, %c0_3] : memref<9x256xf32, #tpu.memory_space<vmem>>, vector<1x256xf32>
    %6 = vector.broadcast %5 : vector<1x256xf32> to vector<16x256xf32>
    %7 = arith.mulf %4, %6 : vector<16x256xf32>
    %8 = arith.truncf %7 : vector<16x256xf32> to vector<16x256xbf16>
    %c0_4 = arith.constant 0 : index
    %c0_5 = arith.constant 0 : index
    %9 = vector.load %arg12[%c0_4, %c0_5] : memref<432x256xbf16, #tpu.memory_space<vmem>>, vector<16x256xbf16>
    tpu.vector_store %arg12[%c0_4, %c0_5], %8 {strides = array<i32>} : memref<432x256xbf16, #tpu.memory_space<vmem>>, vector<16x256xbf16>,
    %c16_i32 = arith.constant 16 : i32
    %10 = tpu.dynamic_rotate %3 by %c16_i32 dim 1 : vector<16x256xf32>, i32 -> vector<16x256xf32>
    %c1 = arith.constant 1 : index
    %c0_6 = arith.constant 0 : index
    %11 = vector.load %arg2[%c1, %c0_6] : memref<9x256xf32, #tpu.memory_space<vmem>>, vector<1x256xf32>
    %12 = vector.broadcast %11 : vector<1x256xf32> to vector<16x256xf32>
    %13 = arith.mulf %10, %12 : vector<16x256xf32>
    %14 = arith.truncf %13 : vector<16x256xf32> to vector<16x256xbf16>
    %c16 = arith.constant 16 : index
    %c0_7 = arith.constant 0 : index
    %15 = vector.load %arg12[%c16, %c0_7] : memref<432x256xbf16, #tpu.memory_space<vmem>>, vector<16x256xbf16>
    tpu.vector_store %arg12[%c16, %c0_7], %14 {strides = array<i32>} : memref<432x256xbf16, #tpu.memory_space<vmem>>, vector<16x256xbf16>,
    %c15_i32 = arith.constant 15 : i32
    %16 = tpu.dynamic_rotate %3 by %c15_i32 dim 1 : vector<16x256xf32>, i32 -> vector<16x256xf32>
    %c2 = arith.constant 2 : index
    %c0_8 = arith.constant 0 : index
    %17 = vector.load %arg2[%c2, %c0_8] : memref<9x256xf32, #tpu.memory_space<vmem>>, vector<1x256xf32>
    %18 = vector.broadcast %17 : vector<1x256xf32> to vector<16x256xf32>
    %19 = arith.mulf %16, %18 : vector<16x256xf32>
    %20 = arith.truncf %19 : vector<16x256xf32> to vector<16x256xbf16>
    %c32 = arith.constant 32 : index
    %c0_9 = arith.constant 0 : index
    %21 = vector.load %arg12[%c32, %c0_9] : memref<432x256xbf16, #tpu.memory_space<vmem>>, vector<16x256xbf16>
    tpu.vector_store %arg12[%c32, %c0_9], %20 {strides = array<i32>} : memref<432x256xbf16, #tpu.memory_space<vmem>>, vector<16x256xbf16>,
    %c1_i32 = arith.constant 1 : i32
    %22 = tpu.dynamic_rotate %3 by %c1_i32 dim 1 : vector<16x256xf32>, i32 -> vector<16x256xf32>
    %c3 = arith.constant 3 : index
    %c0_10 = arith.constant 0 : index
    %23 = vector.load %arg2[%c3, %c0_10] : memref<9x256xf32, #tpu.memory_space<vmem>>, vector<1x256xf32>
    %24 = vector.broadcast %23 : vector<1x256xf32> to vector<16x256xf32>
    %25 = arith.mulf %22, %24 : vector<16x256xf32>
    %26 = arith.truncf %25 : vector<16x256xf32> to vector<16x256xbf16>
    %c48 = arith.constant 48 : index
    %c0_11 = arith.constant 0 : index
    %27 = vector.load %arg12[%c48, %c0_11] : memref<432x256xbf16, #tpu.memory_space<vmem>>, vector<16x256xbf16>
    tpu.vector_store %arg12[%c48, %c0_11], %26 {strides = array<i32>} : memref<432x256xbf16, #tpu.memory_space<vmem>>, vector<16x256xbf16>,
    %28 = arith.truncf %3 : vector<16x256xf32> to vector<16x256xbf16>
    %c64 = arith.constant 64 : index
    %c0_12 = arith.constant 0 : index
    %29 = vector.load %arg12[%c64, %c0_12] : memref<432x256xbf16, #tpu.memory_space<vmem>>, vector<16x256xbf16>
    tpu.vector_store %arg12[%c64, %c0_12], %28 {strides = array<i32>} : memref<432x256xbf16, #tpu.memory_space<vmem>>, vector<16x256xbf16>,
    %c255_i32 = arith.constant 255 : i32
    %30 = tpu.dynamic_rotate %3 by %c255_i32 dim 1 : vector<16x256xf32>, i32 -> vector<16x256xf32>
    %c5 = arith.constant 5 : index
    %c0_13 = arith.constant 0 : index
    %31 = vector.load %arg2[%c5, %c0_13] : memref<9x256xf32, #tpu.memory_space<vmem>>, vector<1x256xf32>
    %32 = vector.broadcast %31 : vector<1x256xf32> to vector<16x256xf32>
    %33 = arith.mulf %30, %32 : vector<16x256xf32>
    %34 = arith.truncf %33 : vector<16x256xf32> to vector<16x256xbf16>
    %c80 = arith.constant 80 : index
    %c0_14 = arith.constant 0 : index
    %35 = vector.load %arg12[%c80, %c0_14] : memref<432x256xbf16, #tpu.memory_space<vmem>>, vector<16x256xbf16>
    tpu.vector_store %arg12[%c80, %c0_14], %34 {strides = array<i32>} : memref<432x256xbf16, #tpu.memory_space<vmem>>, vector<16x256xbf16>,
    %c241_i32 = arith.constant 241 : i32
    %36 = tpu.dynamic_rotate %3 by %c241_i32 dim 1 : vector<16x256xf32>, i32 -> vector<16x256xf32>
    %c6 = arith.constant 6 : index
    %c0_15 = arith.constant 0 : index
    %37 = vector.load %arg2[%c6, %c0_15] : memref<9x256xf32, #tpu.memory_space<vmem>>, vector<1x256xf32>
    %38 = vector.broadcast %37 : vector<1x256xf32> to vector<16x256xf32>
    %39 = arith.mulf %36, %38 : vector<16x256xf32>
    %40 = arith.truncf %39 : vector<16x256xf32> to vector<16x256xbf16>
    %c96 = arith.constant 96 : index
    %c0_16 = arith.constant 0 : index
    %41 = vector.load %arg12[%c96, %c0_16] : memref<432x256xbf16, #tpu.memory_space<vmem>>, vector<16x256xbf16>
    tpu.vector_store %arg12[%c96, %c0_16], %40 {strides = array<i32>} : memref<432x256xbf16, #tpu.memory_space<vmem>>, vector<16x256xbf16>,
    %c240_i32 = arith.constant 240 : i32
    %42 = tpu.dynamic_rotate %3 by %c240_i32 dim 1 : vector<16x256xf32>, i32 -> vector<16x256xf32>
    %c7 = arith.constant 7 : index
    %c0_17 = arith.constant 0 : index
    %43 = vector.load %arg2[%c7, %c0_17] : memref<9x256xf32, #tpu.memory_space<vmem>>, vector<1x256xf32>
    %44 = vector.broadcast %43 : vector<1x256xf32> to vector<16x256xf32>
    %45 = arith.mulf %42, %44 : vector<16x256xf32>
    %46 = arith.truncf %45 : vector<16x256xf32> to vector<16x256xbf16>
    %c112 = arith.constant 112 : index
    %c0_18 = arith.constant 0 : index
    %47 = vector.load %arg12[%c112, %c0_18] : memref<432x256xbf16, #tpu.memory_space<vmem>>, vector<16x256xbf16>
    tpu.vector_store %arg12[%c112, %c0_18], %46 {strides = array<i32>} : memref<432x256xbf16, #tpu.memory_space<vmem>>, vector<16x256xbf16>,
    %c239_i32 = arith.constant 239 : i32
    %48 = tpu.dynamic_rotate %3 by %c239_i32 dim 1 : vector<16x256xf32>, i32 -> vector<16x256xf32>
    %c8 = arith.constant 8 : index
    %c0_19 = arith.constant 0 : index
    %49 = vector.load %arg2[%c8, %c0_19] : memref<9x256xf32, #tpu.memory_space<vmem>>, vector<1x256xf32>
    %50 = vector.broadcast %49 : vector<1x256xf32> to vector<16x256xf32>
    %51 = arith.mulf %48, %50 : vector<16x256xf32>
    %52 = arith.truncf %51 : vector<16x256xf32> to vector<16x256xbf16>
    %c128 = arith.constant 128 : index
    %c0_20 = arith.constant 0 : index
    %53 = vector.load %arg12[%c128, %c0_20] : memref<432x256xbf16, #tpu.memory_space<vmem>>, vector<16x256xbf16>
    tpu.vector_store %arg12[%c128, %c0_20], %52 {strides = array<i32>} : memref<432x256xbf16, #tpu.memory_space<vmem>>, vector<16x256xbf16>,
    %c0_21 = arith.constant 0 : index
    %c0_22 = arith.constant 0 : index
    %54 = vector.load %arg3[%c0_21, %c0_22] : memref<8x144xbf16, #tpu.memory_space<vmem>>, vector<8x144xbf16>
    %c0_23 = arith.constant 0 : index
    %c0_24 = arith.constant 0 : index
    %55 = vector.load %arg12[%c0_23, %c0_24] : memref<432x256xbf16, #tpu.memory_space<vmem>>, vector<144x256xbf16>
    %cst_25 = arith.constant dense<0.000000e+00> : vector<8x256xf32>
    %56 = tpu.matmul %54, %55, %cst_25 {dimension_numbers = #tpu.dot_dimension_numbers<[1], [0], [0], [1], [0, 0, 1, 1], [], []>} : vector<8x144xbf16>, vector<144x256xbf16>, vector<8x256xf32> -> vector<8x256xf32>
    %c0_26 = arith.constant 0 : index
    %c0_27 = arith.constant 0 : index
    %57 = vector.load %arg4[%c0_26, %c0_27] : memref<8x1xf32, #tpu.memory_space<vmem>>, vector<8x1xf32>
    %58 = vector.broadcast %57 : vector<8x1xf32> to vector<8x256xf32>
    %59 = arith.addf %56, %58 : vector<8x256xf32>
    %cst_28 = arith.constant 0.000000e+00 : f32
    %60 = vector.broadcast %cst_28 : f32 to vector<8x256xf32>
    %61 = arith.maximumf %59, %60 : vector<8x256xf32>
    %cst_29 = arith.constant 0.000000e+00 : f32
    %62 = vector.broadcast %cst_29 : f32 to vector<8x256xf32>
    %63 = tpu.concatenate %61, %62 in 0 : vector<8x256xf32>, vector<8x256xf32> -> vector<16x256xf32>
    %c17_i32_30 = arith.constant 17 : i32
    %64 = tpu.dynamic_rotate %63 by %c17_i32_30 dim 1 : vector<16x256xf32>, i32 -> vector<16x256xf32>
    %c0_31 = arith.constant 0 : index
    %c0_32 = arith.constant 0 : index
    %65 = vector.load %arg2[%c0_31, %c0_32] : memref<9x256xf32, #tpu.memory_space<vmem>>, vector<1x256xf32>
    %66 = vector.broadcast %65 : vector<1x256xf32> to vector<16x256xf32>
    %67 = arith.mulf %64, %66 : vector<16x256xf32>
    %68 = arith.truncf %67 : vector<16x256xf32> to vector<16x256xbf16>
    %c144 = arith.constant 144 : index
    %c0_33 = arith.constant 0 : index
    %69 = vector.load %arg12[%c144, %c0_33] : memref<432x256xbf16, #tpu.memory_space<vmem>>, vector<16x256xbf16>
    tpu.vector_store %arg12[%c144, %c0_33], %68 {strides = array<i32>} : memref<432x256xbf16, #tpu.memory_space<vmem>>, vector<16x256xbf16>,
    %c16_i32_34 = arith.constant 16 : i32
    %70 = tpu.dynamic_rotate %63 by %c16_i32_34 dim 1 : vector<16x256xf32>, i32 -> vector<16x256xf32>
    %c1_35 = arith.constant 1 : index
    %c0_36 = arith.constant 0 : index
    %71 = vector.load %arg2[%c1_35, %c0_36] : memref<9x256xf32, #tpu.memory_space<vmem>>, vector<1x256xf32>
    %72 = vector.broadcast %71 : vector<1x256xf32> to vector<16x256xf32>
    %73 = arith.mulf %70, %72 : vector<16x256xf32>
    %74 = arith.truncf %73 : vector<16x256xf32> to vector<16x256xbf16>
    %c160 = arith.constant 160 : index
    %c0_37 = arith.constant 0 : index
    %75 = vector.load %arg12[%c160, %c0_37] : memref<432x256xbf16, #tpu.memory_space<vmem>>, vector<16x256xbf16>
    tpu.vector_store %arg12[%c160, %c0_37], %74 {strides = array<i32>} : memref<432x256xbf16, #tpu.memory_space<vmem>>, vector<16x256xbf16>,
    %c15_i32_38 = arith.constant 15 : i32
    %76 = tpu.dynamic_rotate %63 by %c15_i32_38 dim 1 : vector<16x256xf32>, i32 -> vector<16x256xf32>
    %c2_39 = arith.constant 2 : index
    %c0_40 = arith.constant 0 : index
    %77 = vector.load %arg2[%c2_39, %c0_40] : memref<9x256xf32, #tpu.memory_space<vmem>>, vector<1x256xf32>
    %78 = vector.broadcast %77 : vector<1x256xf32> to vector<16x256xf32>
    %79 = arith.mulf %76, %78 : vector<16x256xf32>
    %80 = arith.truncf %79 : vector<16x256xf32> to vector<16x256xbf16>
    %c176 = arith.constant 176 : index
    %c0_41 = arith.constant 0 : index
    %81 = vector.load %arg12[%c176, %c0_41] : memref<432x256xbf16, #tpu.memory_space<vmem>>, vector<16x256xbf16>
    tpu.vector_store %arg12[%c176, %c0_41], %80 {strides = array<i32>} : memref<432x256xbf16, #tpu.memory_space<vmem>>, vector<16x256xbf16>,
    %c1_i32_42 = arith.constant 1 : i32
    %82 = tpu.dynamic_rotate %63 by %c1_i32_42 dim 1 : vector<16x256xf32>, i32 -> vector<16x256xf32>
    %c3_43 = arith.constant 3 : index
    %c0_44 = arith.constant 0 : index
    %83 = vector.load %arg2[%c3_43, %c0_44] : memref<9x256xf32, #tpu.memory_space<vmem>>, vector<1x256xf32>
    %84 = vector.broadcast %83 : vector<1x256xf32> to vector<16x256xf32>
    %85 = arith.mulf %82, %84 : vector<16x256xf32>
    %86 = arith.truncf %85 : vector<16x256xf32> to vector<16x256xbf16>
    %c192 = arith.constant 192 : index
    %c0_45 = arith.constant 0 : index
    %87 = vector.load %arg12[%c192, %c0_45] : memref<432x256xbf16, #tpu.memory_space<vmem>>, vector<16x256xbf16>
    tpu.vector_store %arg12[%c192, %c0_45], %86 {strides = array<i32>} : memref<432x256xbf16, #tpu.memory_space<vmem>>, vector<16x256xbf16>,
    %88 = arith.truncf %63 : vector<16x256xf32> to vector<16x256xbf16>
    %c208 = arith.constant 208 : index
    %c0_46 = arith.constant 0 : index
    %89 = vector.load %arg12[%c208, %c0_46] : memref<432x256xbf16, #tpu.memory_space<vmem>>, vector<16x256xbf16>
    tpu.vector_store %arg12[%c208, %c0_46], %88 {strides = array<i32>} : memref<432x256xbf16, #tpu.memory_space<vmem>>, vector<16x256xbf16>,
    %c255_i32_47 = arith.constant 255 : i32
    %90 = tpu.dynamic_rotate %63 by %c255_i32_47 dim 1 : vector<16x256xf32>, i32 -> vector<16x256xf32>
    %c5_48 = arith.constant 5 : index
    %c0_49 = arith.constant 0 : index
    %91 = vector.load %arg2[%c5_48, %c0_49] : memref<9x256xf32, #tpu.memory_space<vmem>>, vector<1x256xf32>
    %92 = vector.broadcast %91 : vector<1x256xf32> to vector<16x256xf32>
    %93 = arith.mulf %90, %92 : vector<16x256xf32>
    %94 = arith.truncf %93 : vector<16x256xf32> to vector<16x256xbf16>
    %c224 = arith.constant 224 : index
    %c0_50 = arith.constant 0 : index
    %95 = vector.load %arg12[%c224, %c0_50] : memref<432x256xbf16, #tpu.memory_space<vmem>>, vector<16x256xbf16>
    tpu.vector_store %arg12[%c224, %c0_50], %94 {strides = array<i32>} : memref<432x256xbf16, #tpu.memory_space<vmem>>, vector<16x256xbf16>,
    %c241_i32_51 = arith.constant 241 : i32
    %96 = tpu.dynamic_rotate %63 by %c241_i32_51 dim 1 : vector<16x256xf32>, i32 -> vector<16x256xf32>
    %c6_52 = arith.constant 6 : index
    %c0_53 = arith.constant 0 : index
    %97 = vector.load %arg2[%c6_52, %c0_53] : memref<9x256xf32, #tpu.memory_space<vmem>>, vector<1x256xf32>
    %98 = vector.broadcast %97 : vector<1x256xf32> to vector<16x256xf32>
    %99 = arith.mulf %96, %98 : vector<16x256xf32>
    %100 = arith.truncf %99 : vector<16x256xf32> to vector<16x256xbf16>
    %c240 = arith.constant 240 : index
    %c0_54 = arith.constant 0 : index
    %101 = vector.load %arg12[%c240, %c0_54] : memref<432x256xbf16, #tpu.memory_space<vmem>>, vector<16x256xbf16>
    tpu.vector_store %arg12[%c240, %c0_54], %100 {strides = array<i32>} : memref<432x256xbf16, #tpu.memory_space<vmem>>, vector<16x256xbf16>,
    %c240_i32_55 = arith.constant 240 : i32
    %102 = tpu.dynamic_rotate %63 by %c240_i32_55 dim 1 : vector<16x256xf32>, i32 -> vector<16x256xf32>
    %c7_56 = arith.constant 7 : index
    %c0_57 = arith.constant 0 : index
    %103 = vector.load %arg2[%c7_56, %c0_57] : memref<9x256xf32, #tpu.memory_space<vmem>>, vector<1x256xf32>
    %104 = vector.broadcast %103 : vector<1x256xf32> to vector<16x256xf32>
    %105 = arith.mulf %102, %104 : vector<16x256xf32>
    %106 = arith.truncf %105 : vector<16x256xf32> to vector<16x256xbf16>
    %c256 = arith.constant 256 : index
    %c0_58 = arith.constant 0 : index
    %107 = vector.load %arg12[%c256, %c0_58] : memref<432x256xbf16, #tpu.memory_space<vmem>>, vector<16x256xbf16>
    tpu.vector_store %arg12[%c256, %c0_58], %106 {strides = array<i32>} : memref<432x256xbf16, #tpu.memory_space<vmem>>, vector<16x256xbf16>,
    %c239_i32_59 = arith.constant 239 : i32
    %108 = tpu.dynamic_rotate %63 by %c239_i32_59 dim 1 : vector<16x256xf32>, i32 -> vector<16x256xf32>
    %c8_60 = arith.constant 8 : index
    %c0_61 = arith.constant 0 : index
    %109 = vector.load %arg2[%c8_60, %c0_61] : memref<9x256xf32, #tpu.memory_space<vmem>>, vector<1x256xf32>
    %110 = vector.broadcast %109 : vector<1x256xf32> to vector<16x256xf32>
    %111 = arith.mulf %108, %110 : vector<16x256xf32>
    %112 = arith.truncf %111 : vector<16x256xf32> to vector<16x256xbf16>
    %c272 = arith.constant 272 : index
    %c0_62 = arith.constant 0 : index
    %113 = vector.load %arg12[%c272, %c0_62] : memref<432x256xbf16, #tpu.memory_space<vmem>>, vector<16x256xbf16>
    tpu.vector_store %arg12[%c272, %c0_62], %112 {strides = array<i32>} : memref<432x256xbf16, #tpu.memory_space<vmem>>, vector<16x256xbf16>,
    %c0_63 = arith.constant 0 : index
    %c0_64 = arith.constant 0 : index
    %114 = vector.load %arg5[%c0_63, %c0_64] : memref<16x288xbf16, #tpu.memory_space<vmem>>, vector<16x288xbf16>
    %c0_65 = arith.constant 0 : index
    %c0_66 = arith.constant 0 : index
    %115 = vector.load %arg12[%c0_65, %c0_66] : memref<432x256xbf16, #tpu.memory_space<vmem>>, vector<288x256xbf16>
    %cst_67 = arith.constant dense<0.000000e+00> : vector<16x256xf32>
    %116 = tpu.matmul %114, %115, %cst_67 {dimension_numbers = #tpu.dot_dimension_numbers<[1], [0], [0], [1], [0, 0, 1, 1], [], []>} : vector<16x288xbf16>, vector<288x256xbf16>, vector<16x256xf32> -> vector<16x256xf32>
    %c0_68 = arith.constant 0 : index
    %c0_69 = arith.constant 0 : index
    %117 = vector.load %arg6[%c0_68, %c0_69] : memref<16x1xf32, #tpu.memory_space<vmem>>, vector<16x1xf32>
    %118 = vector.broadcast %117 : vector<16x1xf32> to vector<16x256xf32>
    %119 = arith.addf %116, %118 : vector<16x256xf32>
    %cst_70 = arith.constant 0.000000e+00 : f32
    %120 = vector.broadcast %cst_70 : f32 to vector<16x256xf32>
    %121 = arith.maximumf %119, %120 : vector<16x256xf32>
    %c17_i32_71 = arith.constant 17 : i32
    %122 = tpu.dynamic_rotate %121 by %c17_i32_71 dim 1 : vector<16x256xf32>, i32 -> vector<16x256xf32>
    %c0_72 = arith.constant 0 : index
    %c0_73 = arith.constant 0 : index
    %123 = vector.load %arg2[%c0_72, %c0_73] : memref<9x256xf32, #tpu.memory_space<vmem>>, vector<1x256xf32>
    %124 = vector.broadcast %123 : vector<1x256xf32> to vector<16x256xf32>
    %125 = arith.mulf %122, %124 : vector<16x256xf32>
    %126 = arith.truncf %125 : vector<16x256xf32> to vector<16x256xbf16>
    %c288 = arith.constant 288 : index
    %c0_74 = arith.constant 0 : index
    %127 = vector.load %arg12[%c288, %c0_74] : memref<432x256xbf16, #tpu.memory_space<vmem>>, vector<16x256xbf16>
    tpu.vector_store %arg12[%c288, %c0_74], %126 {strides = array<i32>} : memref<432x256xbf16, #tpu.memory_space<vmem>>, vector<16x256xbf16>,
    %c16_i32_75 = arith.constant 16 : i32
    %128 = tpu.dynamic_rotate %121 by %c16_i32_75 dim 1 : vector<16x256xf32>, i32 -> vector<16x256xf32>
    %c1_76 = arith.constant 1 : index
    %c0_77 = arith.constant 0 : index
    %129 = vector.load %arg2[%c1_76, %c0_77] : memref<9x256xf32, #tpu.memory_space<vmem>>, vector<1x256xf32>
    %130 = vector.broadcast %129 : vector<1x256xf32> to vector<16x256xf32>
    %131 = arith.mulf %128, %130 : vector<16x256xf32>
    %132 = arith.truncf %131 : vector<16x256xf32> to vector<16x256xbf16>
    %c304 = arith.constant 304 : index
    %c0_78 = arith.constant 0 : index
    %133 = vector.load %arg12[%c304, %c0_78] : memref<432x256xbf16, #tpu.memory_space<vmem>>, vector<16x256xbf16>
    tpu.vector_store %arg12[%c304, %c0_78], %132 {strides = array<i32>} : memref<432x256xbf16, #tpu.memory_space<vmem>>, vector<16x256xbf16>,
    %c15_i32_79 = arith.constant 15 : i32
    %134 = tpu.dynamic_rotate %121 by %c15_i32_79 dim 1 : vector<16x256xf32>, i32 -> vector<16x256xf32>
    %c2_80 = arith.constant 2 : index
    %c0_81 = arith.constant 0 : index
    %135 = vector.load %arg2[%c2_80, %c0_81] : memref<9x256xf32, #tpu.memory_space<vmem>>, vector<1x256xf32>
    %136 = vector.broadcast %135 : vector<1x256xf32> to vector<16x256xf32>
    %137 = arith.mulf %134, %136 : vector<16x256xf32>
    %138 = arith.truncf %137 : vector<16x256xf32> to vector<16x256xbf16>
    %c320 = arith.constant 320 : index
    %c0_82 = arith.constant 0 : index
    %139 = vector.load %arg12[%c320, %c0_82] : memref<432x256xbf16, #tpu.memory_space<vmem>>, vector<16x256xbf16>
    tpu.vector_store %arg12[%c320, %c0_82], %138 {strides = array<i32>} : memref<432x256xbf16, #tpu.memory_space<vmem>>, vector<16x256xbf16>,
    %c1_i32_83 = arith.constant 1 : i32
    %140 = tpu.dynamic_rotate %121 by %c1_i32_83 dim 1 : vector<16x256xf32>, i32 -> vector<16x256xf32>
    %c3_84 = arith.constant 3 : index
    %c0_85 = arith.constant 0 : index
    %141 = vector.load %arg2[%c3_84, %c0_85] : memref<9x256xf32, #tpu.memory_space<vmem>>, vector<1x256xf32>
    %142 = vector.broadcast %141 : vector<1x256xf32> to vector<16x256xf32>
    %143 = arith.mulf %140, %142 : vector<16x256xf32>
    %144 = arith.truncf %143 : vector<16x256xf32> to vector<16x256xbf16>
    %c336 = arith.constant 336 : index
    %c0_86 = arith.constant 0 : index
    %145 = vector.load %arg12[%c336, %c0_86] : memref<432x256xbf16, #tpu.memory_space<vmem>>, vector<16x256xbf16>
    tpu.vector_store %arg12[%c336, %c0_86], %144 {strides = array<i32>} : memref<432x256xbf16, #tpu.memory_space<vmem>>, vector<16x256xbf16>,
    %146 = arith.truncf %121 : vector<16x256xf32> to vector<16x256xbf16>
    %c352 = arith.constant 352 : index
    %c0_87 = arith.constant 0 : index
    %147 = vector.load %arg12[%c352, %c0_87] : memref<432x256xbf16, #tpu.memory_space<vmem>>, vector<16x256xbf16>
    tpu.vector_store %arg12[%c352, %c0_87], %146 {strides = array<i32>} : memref<432x256xbf16, #tpu.memory_space<vmem>>, vector<16x256xbf16>,
    %c255_i32_88 = arith.constant 255 : i32
    %148 = tpu.dynamic_rotate %121 by %c255_i32_88 dim 1 : vector<16x256xf32>, i32 -> vector<16x256xf32>
    %c5_89 = arith.constant 5 : index
    %c0_90 = arith.constant 0 : index
    %149 = vector.load %arg2[%c5_89, %c0_90] : memref<9x256xf32, #tpu.memory_space<vmem>>, vector<1x256xf32>
    %150 = vector.broadcast %149 : vector<1x256xf32> to vector<16x256xf32>
    %151 = arith.mulf %148, %150 : vector<16x256xf32>
    %152 = arith.truncf %151 : vector<16x256xf32> to vector<16x256xbf16>
    %c368 = arith.constant 368 : index
    %c0_91 = arith.constant 0 : index
    %153 = vector.load %arg12[%c368, %c0_91] : memref<432x256xbf16, #tpu.memory_space<vmem>>, vector<16x256xbf16>
    tpu.vector_store %arg12[%c368, %c0_91], %152 {strides = array<i32>} : memref<432x256xbf16, #tpu.memory_space<vmem>>, vector<16x256xbf16>,
    %c241_i32_92 = arith.constant 241 : i32
    %154 = tpu.dynamic_rotate %121 by %c241_i32_92 dim 1 : vector<16x256xf32>, i32 -> vector<16x256xf32>
    %c6_93 = arith.constant 6 : index
    %c0_94 = arith.constant 0 : index
    %155 = vector.load %arg2[%c6_93, %c0_94] : memref<9x256xf32, #tpu.memory_space<vmem>>, vector<1x256xf32>
    %156 = vector.broadcast %155 : vector<1x256xf32> to vector<16x256xf32>
    %157 = arith.mulf %154, %156 : vector<16x256xf32>
    %158 = arith.truncf %157 : vector<16x256xf32> to vector<16x256xbf16>
    %c384 = arith.constant 384 : index
    %c0_95 = arith.constant 0 : index
    %159 = vector.load %arg12[%c384, %c0_95] : memref<432x256xbf16, #tpu.memory_space<vmem>>, vector<16x256xbf16>
    tpu.vector_store %arg12[%c384, %c0_95], %158 {strides = array<i32>} : memref<432x256xbf16, #tpu.memory_space<vmem>>, vector<16x256xbf16>,
    %c240_i32_96 = arith.constant 240 : i32
    %160 = tpu.dynamic_rotate %121 by %c240_i32_96 dim 1 : vector<16x256xf32>, i32 -> vector<16x256xf32>
    %c7_97 = arith.constant 7 : index
    %c0_98 = arith.constant 0 : index
    %161 = vector.load %arg2[%c7_97, %c0_98] : memref<9x256xf32, #tpu.memory_space<vmem>>, vector<1x256xf32>
    %162 = vector.broadcast %161 : vector<1x256xf32> to vector<16x256xf32>
    %163 = arith.mulf %160, %162 : vector<16x256xf32>
    %164 = arith.truncf %163 : vector<16x256xf32> to vector<16x256xbf16>
    %c400 = arith.constant 400 : index
    %c0_99 = arith.constant 0 : index
    %165 = vector.load %arg12[%c400, %c0_99] : memref<432x256xbf16, #tpu.memory_space<vmem>>, vector<16x256xbf16>
    tpu.vector_store %arg12[%c400, %c0_99], %164 {strides = array<i32>} : memref<432x256xbf16, #tpu.memory_space<vmem>>, vector<16x256xbf16>,
    %c239_i32_100 = arith.constant 239 : i32
    %166 = tpu.dynamic_rotate %121 by %c239_i32_100 dim 1 : vector<16x256xf32>, i32 -> vector<16x256xf32>
    %c8_101 = arith.constant 8 : index
    %c0_102 = arith.constant 0 : index
    %167 = vector.load %arg2[%c8_101, %c0_102] : memref<9x256xf32, #tpu.memory_space<vmem>>, vector<1x256xf32>
    %168 = vector.broadcast %167 : vector<1x256xf32> to vector<16x256xf32>
    %169 = arith.mulf %166, %168 : vector<16x256xf32>
    %170 = arith.truncf %169 : vector<16x256xf32> to vector<16x256xbf16>
    %c416 = arith.constant 416 : index
    %c0_103 = arith.constant 0 : index
    %171 = vector.load %arg12[%c416, %c0_103] : memref<432x256xbf16, #tpu.memory_space<vmem>>, vector<16x256xbf16>
    tpu.vector_store %arg12[%c416, %c0_103], %170 {strides = array<i32>} : memref<432x256xbf16, #tpu.memory_space<vmem>>, vector<16x256xbf16>,
    %c0_104 = arith.constant 0 : index
    %c0_105 = arith.constant 0 : index
    %172 = vector.load %arg7[%c0_104, %c0_105] : memref<8x432xbf16, #tpu.memory_space<vmem>>, vector<8x432xbf16>
    %c0_106 = arith.constant 0 : index
    %c0_107 = arith.constant 0 : index
    %173 = vector.load %arg12[%c0_106, %c0_107] : memref<432x256xbf16, #tpu.memory_space<vmem>>, vector<432x256xbf16>
    %cst_108 = arith.constant dense<0.000000e+00> : vector<8x256xf32>
    %174 = tpu.matmul %172, %173, %cst_108 {dimension_numbers = #tpu.dot_dimension_numbers<[1], [0], [0], [1], [0, 0, 1, 1], [], []>} : vector<8x432xbf16>, vector<432x256xbf16>, vector<8x256xf32> -> vector<8x256xf32>
    %c0_109 = arith.constant 0 : index
    %c0_110 = arith.constant 0 : index
    %175 = vector.load %arg8[%c0_109, %c0_110] : memref<8x1xf32, #tpu.memory_space<vmem>>, vector<8x1xf32>
    %176 = vector.broadcast %175 : vector<8x1xf32> to vector<8x256xf32>
    %177 = arith.addf %174, %176 : vector<8x256xf32>
    %c0_111 = arith.constant 0 : index
    %c0_112 = arith.constant 0 : index
    %178 = vector.load %arg9[%c0_111, %c0_112] : memref<8x16xbf16, #tpu.memory_space<vmem>>, vector<8x16xbf16>
    %c64_113 = arith.constant 64 : index
    %c0_114 = arith.constant 0 : index
    %179 = vector.load %arg12[%c64_113, %c0_114] : memref<432x256xbf16, #tpu.memory_space<vmem>>, vector<16x256xbf16>
    %cst_115 = arith.constant dense<0.000000e+00> : vector<8x256xf32>
    %180 = tpu.matmul %178, %179, %cst_115 {dimension_numbers = #tpu.dot_dimension_numbers<[1], [0], [0], [1], [0, 0, 1, 1], [], []>} : vector<8x16xbf16>, vector<16x256xbf16>, vector<8x256xf32> -> vector<8x256xf32>
    %c0_116 = arith.constant 0 : index
    %c0_117 = arith.constant 0 : index
    %181 = vector.load %arg10[%c0_116, %c0_117] : memref<8x1xf32, #tpu.memory_space<vmem>>, vector<8x1xf32>
    %182 = vector.broadcast %181 : vector<8x1xf32> to vector<8x256xf32>
    %183 = arith.addf %180, %182 : vector<8x256xf32>
    %cst_118 = arith.constant 0.000000e+00 : f32
    %184 = vector.broadcast %cst_118 : f32 to vector<8x256xf32>
    %185 = arith.maximumf %177, %184 : vector<8x256xf32>
    %186 = arith.addf %185, %183 : vector<8x256xf32>
    %c0_119 = arith.constant 0 : index
    %c0_120 = arith.constant 0 : index
    %c0_121 = arith.constant 0 : index
    %187 = vector.load %arg11[%c0_119, %c0_120, %c0_121] : memref<1x8x256xf32, #tpu.memory_space<vmem>>, vector<1x8x256xf32>
    %188 = vector.shape_cast %187 : vector<1x8x256xf32> to vector<8x256xf32>
    %189 = vector.shape_cast %186 : vector<8x256xf32> to vector<1x8x256xf32>
    tpu.vector_store %arg11[%c0_119, %c0_120, %c0_121], %189 {strides = array<i32>} : memref<1x8x256xf32, #tpu.memory_space<vmem>>, vector<1x8x256xf32>,
    return
  }
  func.func @transform_0(%arg0: i32) -> (i32, i32, i32) {
    %c0_i32 = arith.constant 0 : i32
    %c0_i32_0 = arith.constant 0 : i32
    %c0_i32_1 = arith.constant 0 : i32
    return %arg0, %c0_i32, %c0_i32_0 : i32, i32, i32
  }
  func.func @transform_1(%arg0: i32) -> (i32, i32) {
    %c0_i32 = arith.constant 0 : i32
    %c0_i32_0 = arith.constant 0 : i32
    %c0_i32_1 = arith.constant 0 : i32
    return %c0_i32, %c0_i32_0 : i32, i32
  }
  func.func @transform_2(%arg0: i32) -> (i32, i32) {
    %c0_i32 = arith.constant 0 : i32
    %c0_i32_0 = arith.constant 0 : i32
    %c0_i32_1 = arith.constant 0 : i32
    return %c0_i32, %c0_i32_0 : i32, i32
  }
  func.func @transform_3(%arg0: i32) -> (i32, i32) {
    %c0_i32 = arith.constant 0 : i32
    %c0_i32_0 = arith.constant 0 : i32
    %c0_i32_1 = arith.constant 0 : i32
    return %c0_i32, %c0_i32_0 : i32, i32
  }
  func.func @transform_4(%arg0: i32) -> (i32, i32) {
    %c0_i32 = arith.constant 0 : i32
    %c0_i32_0 = arith.constant 0 : i32
    %c0_i32_1 = arith.constant 0 : i32
    return %c0_i32, %c0_i32_0 : i32, i32
  }
  func.func @transform_5(%arg0: i32) -> (i32, i32) {
    %c0_i32 = arith.constant 0 : i32
    %c0_i32_0 = arith.constant 0 : i32
    %c0_i32_1 = arith.constant 0 : i32
    return %c0_i32, %c0_i32_0 : i32, i32
  }
  func.func @transform_6(%arg0: i32) -> (i32, i32) {
    %c0_i32 = arith.constant 0 : i32
    %c0_i32_0 = arith.constant 0 : i32
    %c0_i32_1 = arith.constant 0 : i32
    return %c0_i32, %c0_i32_0 : i32, i32
  }
  func.func @transform_7(%arg0: i32) -> (i32, i32) {
    %c0_i32 = arith.constant 0 : i32
    %c0_i32_0 = arith.constant 0 : i32
    %c0_i32_1 = arith.constant 0 : i32
    return %c0_i32, %c0_i32_0 : i32, i32
  }
  func.func @transform_8(%arg0: i32) -> (i32, i32) {
    %c0_i32 = arith.constant 0 : i32
    %c0_i32_0 = arith.constant 0 : i32
    %c0_i32_1 = arith.constant 0 : i32
    return %c0_i32, %c0_i32_0 : i32, i32
  }
  func.func @transform_9(%arg0: i32) -> (i32, i32) {
    %c0_i32 = arith.constant 0 : i32
    %c0_i32_0 = arith.constant 0 : i32
    %c0_i32_1 = arith.constant 0 : i32
    return %c0_i32, %c0_i32_0 : i32, i32
  }
  func.func @transform_10(%arg0: i32) -> (i32, i32, i32) {
    %c0_i32 = arith.constant 0 : i32
    %c0_i32_0 = arith.constant 0 : i32
    %c0_i32_1 = arith.constant 0 : i32
    return %arg0, %c0_i32, %c0_i32_0 : i32, i32, i32
  }
}

</mosaic_0001>

<bundles_post_ra>
// kernel: redense_block_forward.1
= control target key start
LH: loop header
LB: loop body
LE: loop exit
PB: predicated region body
PF: predicated region fallthrough
CT: control target
= control target key end

     0   :  { %s1790_s13 = smov 0   ;;  %s2465_s0 = inlined_call_operand.vmem [shape: f32[2,4,256], index: 0, kind: input, shape index: {}]   ;;  %s2466_s1 = inlined_call_operand.vmem [shape: f32[9,256], index: 1, kind: input, shape index: {}]   ;;  %s2467_s2 = inlined_call_operand.vmem [shape: bf16[8,144], index: 2, kind: input, shape index: {}]   ;;  %s2468_s3 = inlined_call_operand.vmem [shape: f32[8,1], index: 3, kind: input, shape index: {}]   ;;  %s2469_s4 = inlined_call_operand.vmem [shape: bf16[16,288], index: 4, kind: input, shape index: {}]   ;;  %s2470_s5 = inlined_call_operand.vmem [shape: f32[16,1], index: 5, kind: input, shape index: {}]   ;;  %s2471_s6 = inlined_call_operand.vmem [shape: bf16[8,432], index: 6, kind: input, shape index: {}]   ;;  %s2472_s7 = inlined_call_operand.vmem [shape: f32[8,1], index: 7, kind: input, shape index: {}]   ;;  %s2473_s8 = inlined_call_operand.vmem [shape: bf16[8,16], index: 8, kind: input, shape index: {}]   ;;  %s2474_s9 = inlined_call_operand.vmem [shape: f32[8,1], index: 9, kind: input, shape index: {}]   ;;  %s2475_s10 = inlined_call_operand.vmem [shape: f32[2,8,256], index: 10, kind: output, shape index: {}]  }
   0x1 LB: > { %s1599_s14 = sadd.s32 4294967295, %s1722_s13   ;;  %p1603_p0 = scmp.ge.s32.totalorder %s1722_s13, 1  ;;  %s1722_s13 = sphi %s1790_s13, %s20_s13  }
   0x2   : > { %p312_p1 = scmp.lt.s32.totalorder %s1722_s13, 3 }
   0x4   : > { %p313_p2 = pnand %p1603_p0, %p312_p1 }
   0x5   : > { %p350_p3 = scmp.lt.s32.totalorder (!%p313_p2), %s1599_s14, 1  ;;  %v1724_v0 = vmov (!%p313_p2), 0.0   ;;  %s1725_s15 = smov (!%p313_p2), 17   ;;  %vm365_vm0 = vcmask (!%p313_p2), 1043456   ;;  %v1844_v5 = vld [vmem:[%s2467_s2] sm:$0xff] (!%p313_p2)  ;;  %vm644_vm1 = vcmask (!%p313_p2), 130048   ;;  %v374_v9 = vlaneseq (!%p313_p2) }
   0x6   : > { %316 = sbr.rel (%p313_p2) target bundleno = 1188 (0x4a4), region = 60  ;;  %370 = vrot.lane.b32.xlu1 (!%p313_p2), %v1724_v0, %s1725_s15  ;;  %s1726_s20 = smov (!%p313_p2), 16   ;;  %v1616_v6 = vcombine.high (!%p313_p2), %v1844_v5, %v1844_v5  ;;  %v632_v7 = vld [vmem:[%s2468_s3] sm:$0xff] (!%p313_p2)  ;;  %v1733_v8 = vmov (!%p313_p2), 0   ;;  %vm1734_vm7 = vmmov (!%p313_p2), 1   ;;  %vm970_vm12 = vcmask (!%p313_p2), 261120  }
   0x7   : > { %s1727_s21 = smov (!%p313_p2), 15   ;;  %s1728_s22 = smov (!%p313_p2), 1   ;;  %1703 = vset.pattern.permute.xlu0 (!%p313_p2), %v1733_v8  ;;  %1704 = vset.pattern.permute.xlu1 (!%p313_p2), %v1733_v8  ;;  %v382_v11 = vshrl.u32 (!%p313_p2), %v374_v9, 7  ;;  %v1863_v13 = vand.u32 (!%p313_p2), 127, %v374_v9  ;;  %vm1959_vm8 = vmpackc.low (!%p313_p2), %vm1734_vm7, %vm365_vm0  ;;  %vm1399_vm13 = vcmask (!%p313_p2), 392192  }
   0x8   : > { %s1729_s23 = smov (!%p313_p2), 127   ;;  %s1730_s24 = smov (!%p313_p2), 113   ;;  %1617 = vmatprep.mubr.msk.bf16.mxu1 (!%p313_p2), %vm644_vm1, %v1616_v6  ;;  %v379_v16 = vld [vmem:[%s2466_s1] ss:$8 sm:$0x3] (!%p313_p2) }
   0x9   : > { %s1731_s25 = smov (!%p313_p2), 112   ;;  %s1732_s26 = smov (!%p313_p2), 111   ;;  %v1865_v14 = vsub.s32 (!%p313_p2), 0, %v382_v11  ;;  %v1867_v15 = vsub.s32 (!%p313_p2), 1, %v382_v11  ;;  %vm376_vm2 = vcmp.lt.s32.totalorder (!%p313_p2), %v1863_v13, 17  ;;  %vm405_vm3 = vcmp.lt.s32.totalorder (!%p313_p2), %v1863_v13, 16 }
   0xa   : > { %401 = vrot.lane.b32.xlu1 (!%p313_p2), %v1724_v0, %s1726_s20  ;;  %v1608_v21 = vld [vmem:[%s2466_s1 + $0x1] ss:$8 sm:$0x3] (!%p313_p2)  ;;  %v1609_v41 = vld [vmem:[%s2466_s1 + $0x2] ss:$8 sm:$0x3] (!%p313_p2) }
   0xb   : > { %v384_v19 = vrot.slane (!%p313_p2), %v379_v16, %v1865_v14  ;;  %v388_v20 = vrot.slane (!%p313_p2), %v379_v16, %v1867_v15  ;;  %v414_v25 = vrot.slane (!%p313_p2), %v1608_v21, %v1865_v14  ;;  %v418_v26 = vrot.slane (!%p313_p2), %v1608_v21, %v1867_v15  ;;  %v1610_v49 = vld [vmem:[%s2466_s1 + $0x3] ss:$8 sm:$0x3] (!%p313_p2)  ;;  %v1611_v16 = vld [vmem:[%s2466_s1 + $0x5] ss:$8 sm:$0x3] (!%p313_p2) }
   0xc   : > { %vm435_vm4 = vcmp.lt.s32.totalorder (!%p313_p2), %v1863_v13, 15  ;;  %v444_v46 = vrot.slane (!%p313_p2), %v1609_v41, %v1865_v14  ;;  %v448_v47 = vrot.slane (!%p313_p2), %v1609_v41, %v1867_v15  ;;  %v474_v53 = vrot.slane (!%p313_p2), %v1610_v49, %v1865_v14 }
   0xd   : > { %s2479_s14 = smov (!%p350_p3, %s1599_s14), 1  ;;  %v478_v54 = vrot.slane %v1610_v49, %v1867_v15  ;;  %vm465_vm5 = vcmp.lt.s32.totalorder %v1863_v13, 1  ;;  %vm499_vm6 = vcmp.lt.s32.totalorder %v1863_v13, 127  ;;  %v512_v21 = vrot.slane %v1611_v16, %v1867_v15  ;;  %v1613_v49 = vld [vmem:[%s2466_s1 + $0x7] ss:$8 sm:$0x3] }
   0xe   : > { %s1644_s16 = sshll.u32 %s2479_s14, 3  ;;  %vm529_vm9 = vcmp.lt.s32.totalorder %v1863_v13, 113  ;;  %vm559_vm10 = vcmp.lt.s32.totalorder %v1863_v13, 112  ;;  %vm589_vm11 = vcmp.lt.s32.totalorder %v1863_v13, 111 }
   0xf   : > { %s354_s19 = scalar_lea.vmem %s2465_s0, %s1644_s16 }
  0x10   : > { %v1808_v1 = vld [vmem:[%s354_s19] sm:$0xff] }
  0x11   : > { %v366_v2 = vsel %vm365_vm0, %v1808_v1, 0.0  ;;  %v1814_v3 = vcombine.high %v1808_v1, %v1808_v1 }
  0x12   : > { %368 = vrot.lane.b32.xlu0 %v366_v2, %s1725_s15  ;;  %399 = vrot.lane.b32.xlu1 %v366_v2, %s1726_s20 }
  0x13   : > { %v367_v4 = vsel %vm365_vm0, %v1814_v3, 0.0 }
  0x16   : > { %372 = vrot.lane.b32.xlu0 %v367_v4, %s1725_s15  ;;  %433 = vrot.lane.b32.xlu1 %v367_v4, %s1727_s21 }
  0x1a   : > { %403 = vrot.lane.b32.xlu0 %v367_v4, %s1726_s20  ;;  %459 = vrot.lane.b32.xlu1 %v366_v2, %s1728_s22 }
  0x1e   : > { %429 = vrot.lane.b32.xlu0 %v366_v2, %s1727_s21  ;;  %461 = vrot.lane.b32.xlu1 %v1724_v0, %s1728_s22 }
  0x22   : > { %431 = vrot.lane.b32.xlu0 %v1724_v0, %s1727_s21  ;;  %497 = vrot.lane.b32.xlu1 %v367_v4, %s1729_s23 }
  0x26   : > { %463 = vrot.lane.b32.xlu0 %v367_v4, %s1728_s22  ;;  %523 = vrot.lane.b32.xlu1 %v366_v2, %s1730_s24 }
  0x2a   : > { %493 = vrot.lane.b32.xlu0 %v366_v2, %s1729_s23  ;;  %525 = vrot.lane.b32.xlu1 %v1724_v0, %s1730_s24 }
  0x2e   : > { %495 = vrot.lane.b32.xlu0 %v1724_v0, %s1729_s23  ;;  %557 = vrot.lane.b32.xlu1 %v367_v4, %s1731_s25 }
  0x32   : > { %527 = vrot.lane.b32.xlu0 %v367_v4, %s1730_s24  ;;  %583 = vrot.lane.b32.xlu1 %v366_v2, %s1732_s26 }
  0x36   : > { %553 = vrot.lane.b32.xlu0 %v366_v2, %s1731_s25  ;;  %585 = vrot.lane.b32.xlu1 %v1724_v0, %s1732_s26 }
  0x3a   : > { %555 = vrot.lane.b32.xlu0 %v1724_v0, %s1731_s25 }
  0x3e   : > { %587 = vrot.lane.b32.xlu0 %v367_v4, %s1732_s26 }
  0x42   : > { %635 = vperm.xlu0 %1703, %v632_v7  }
  0x78   : > { %v1859_v10 = vpop.permute.xlu1 %370 }
  0x79   : > { %v394_v30 = vmul.f32 %v388_v20, %v1859_v10  ;;  %v393_v31 = vmul.f32 %v384_v19, %v1859_v10 }
  0x7c   : > { %v1861_v12 = vpop.permute.xlu1 %401 }
  0x7d   : > { %v424_v37 = vmul.f32 %v418_v26, %v1861_v12  ;;  %v423_v42 = vmul.f32 %v414_v25, %v1861_v12 }
  0x84   : > { %v369_v17 = vpop.permute.xlu0 %368  ;;  %v400_v18 = vpop.permute.xlu1 %399 }
  0x88   : > { %v373_v22 = vpop.permute.xlu0 %372  ;;  %v434_v27 = vpop.permute.xlu1 %433 }
  0x89   : > { %v377_v23 = vsel %vm376_vm2, %v369_v17, %v373_v22  ;;  %v378_v24 = vsel %vm376_vm2, %v373_v22, %v369_v17 }
  0x8a   : > { %v391_v28 = vmul.f32 %v384_v19, %v378_v24  ;;  %v392_v29 = vmul.f32 %v388_v20, %v377_v23  ;;  %v1955_v20 = vpack.c.bf16 %v1724_v0, %v1814_v3  ;;  %v1612_v24 = vld [vmem:[%s2466_s1 + $0x6] ss:$8 sm:$0x3]  ;;  %v508_v3 = vrot.slane %v1611_v16, %v1865_v14 }
  0x8c   : > { %v404_v32 = vpop.permute.xlu0 %403  ;;  %v1887_v33 = vpack.c.bf16 %v394_v30, %v392_v29  ;;  %v1889_v34 = vpack.c.bf16 %v393_v31, %v391_v28  ;;  %v460_v38 = vpop.permute.xlu1 %459  ;;  %v538_v29 = vrot.slane %v1612_v24, %v1865_v14  ;;  %v542_v30 = vrot.slane %v1612_v24, %v1867_v15 }
  0x8d   : > { %v406_v35 = vsel %vm405_vm3, %v400_v18, %v404_v32  ;;  %v407_v36 = vsel %vm405_vm3, %v404_v32, %v400_v18 }
  0x8e   : > { %v421_v39 = vmul.f32 %v414_v25, %v407_v36  ;;  %v422_v40 = vmul.f32 %v418_v26, %v406_v35  ;;  %648 = vmatprep.subr.bf16.mxu1 %v1887_v33  ;;  %1403 = vmatprep.subr.bf16.mxu0 %v1887_v33  ;;  %v1977_v26 = vpack.c.bf16 %v1724_v0, %v1808_v1 }
  0x8f   : > { %649 = vmatpush1.bf16.msra.mxu1 %v1889_v34  ;;  %1404 = vmatpush1.bf16.msra.mxu0 %v1889_v34 }
  0x90   : > { %v430_v43 = vpop.permute.xlu0 %429  ;;  %v1905_v44 = vpack.c.bf16 %v424_v37, %v422_v40  ;;  %v1907_v45 = vpack.c.bf16 %v423_v42, %v421_v39  ;;  %v1911_v48 = vpop.permute.xlu1 %461 }
  0x91   : > { %v436_v50 = vsel %vm435_vm4, %v430_v43, %v434_v27  ;;  %v437_v51 = vsel %vm435_vm4, %v434_v27, %v430_v43  ;;  %v484_v63 = vmul.f32 %v478_v54, %v1911_v48  ;;  %v483_v2 = vmul.f32 %v474_v53, %v1911_v48 }
  0x92   : > { %650 = vmatprep.subr.bf16.mxu1 %v1905_v44  ;;  %1405 = vmatprep.subr.bf16.mxu0 %v1905_v44  ;;  %v451_v55 = vmul.f32 %v444_v46, %v437_v51  ;;  %v452_v56 = vmul.f32 %v448_v47, %v436_v50 }
  0x93   : > { %651 = vmatpush1.bf16.msra.mxu1 %v1907_v45  ;;  %1406 = vmatpush1.bf16.msra.mxu0 %v1907_v45 }
  0x94   : > { %v1924_v52 = vpop.permute.xlu0 %431  ;;  %v498_v59 = vpop.permute.xlu1 %497 }
  0x95   : > { %v453_v57 = vmul.f32 %v444_v46, %v1924_v52  ;;  %v454_v58 = vmul.f32 %v448_v47, %v1924_v52 }
  0x97   : > { %v1931_v60 = vpack.c.bf16 %v454_v58, %v452_v56  ;;  %v1933_v61 = vpack.c.bf16 %v453_v57, %v451_v55  ;;  %v568_v55 = vrot.slane %v1613_v49, %v1865_v14  ;;  %v572_v56 = vrot.slane %v1613_v49, %v1867_v15  ;;  %v1614_v57 = vld [vmem:[%s2466_s1 + $0x10] ss:$8 sm:$0x3] }
  0x98   : > { %v464_v62 = vpop.permute.xlu0 %463  ;;  %v524_v7 = vpop.permute.xlu1 %523 }
  0x99   : > { %v466_v4 = vsel %vm465_vm5, %v460_v38, %v464_v62  ;;  %v467_v6 = vsel %vm465_vm5, %v464_v62, %v460_v38  ;;  %652 = vmatprep.subr.bf16.mxu1 %v1931_v60  ;;  %1407 = vmatprep.subr.bf16.mxu0 %v1931_v60 }
  0x9a   : > { %v481_v9 = vmul.f32 %v474_v53, %v467_v6  ;;  %v482_v11 = vmul.f32 %v478_v54, %v466_v4  ;;  %653 = vmatpush1.bf16.msra.mxu1 %v1933_v61  ;;  %1408 = vmatpush1.bf16.msra.mxu0 %v1933_v61 }
  0x9c   : > { %v494_v17 = vpop.permute.xlu0 %493  ;;  %v1949_v18 = vpack.c.bf16 %v484_v63, %v482_v11  ;;  %v1951_v19 = vpack.c.bf16 %v483_v2, %v481_v9  ;;  %v1963_v23 = vpop.permute.xlu1 %525  ;;  %v598_v63 = vrot.slane %v1614_v57, %v1865_v14  ;;  %v602_v2 = vrot.slane %v1614_v57, %v1867_v15 }
  0x9d   : > { %v501_v25 = vsel %vm499_vm6, %v498_v59, %v494_v17  ;;  %v500_v27 = vsel %vm499_vm6, %v494_v17, %v498_v59  ;;  %v548_v39 = vmul.f32 %v542_v30, %v1963_v23  ;;  %v547_v40 = vmul.f32 %v538_v29, %v1963_v23 }
  0x9e   : > { %654 = vmatprep.subr.bf16.mxu1 %v1949_v18  ;;  %1409 = vmatprep.subr.bf16.mxu0 %v1949_v18  ;;  %v516_v31 = vmul.f32 %v512_v21, %v501_v25  ;;  %v515_v36 = vmul.f32 %v508_v3, %v500_v27 }
  0x9f   : > { %655 = vmatpush1.bf16.msra.mxu1 %v1951_v19  ;;  %1410 = vmatpush1.bf16.msra.mxu0 %v1951_v19 }
  0xa0   : > { %v1981_v28 = vpop.permute.xlu0 %495  ;;  %1648 = vmatprep.subr.msk.bf16.mxu1 %vm1959_vm8, %v1955_v20  ;;  %1660 = vmatprep.subr.msk.bf16.mxu0 %vm1959_vm8, %v1955_v20  ;;  %v558_v35 = vpop.permute.xlu1 %557 }
  0xa1   : > { %v517_v1 = vmul.f32 %v508_v3, %v1981_v28  ;;  %v518_v32 = vmul.f32 %v512_v21, %v1981_v28 }
  0xa3   : > { %1651 = vmatpush1.bf16.msk.msra.mxu1 %vm1959_vm8, %v1977_v26  ;;  %1663 = vmatpush1.bf16.msk.msra.mxu0 %vm1959_vm8, %v1977_v26  ;;  %v2000_v37 = vpack.c.bf16 %v518_v32, %v516_v31  ;;  %v519_v43 = vpack.c.bf16 %v517_v1, %v515_v36  ;;  %v1615_v32 = vcombine.low %v1844_v5, %v1844_v5  ;;  %v2089_v36 = vld [vmem:[%s2471_s6] sm:$0xff] }
  0xa4   : > { %v528_v38 = vpop.permute.xlu0 %527  ;;  %v584_v50 = vpop.permute.xlu1 %583 }
  0xa5   : > { %v530_v41 = vsel %vm529_vm9, %v524_v7, %v528_v38  ;;  %v531_v42 = vsel %vm529_vm9, %v528_v38, %v524_v7  ;;  %658 = vmatprep.subr.bf16.mxu1 %v2000_v37  ;;  %1413 = vmatprep.subr.bf16.mxu0 %v2000_v37  ;;  %v943_v38 = vld [vmem:[%s2470_s5] sm:$0xff] }
  0xa6   : > { %v545_v46 = vmul.f32 %v538_v29, %v530_v41  ;;  %v546_v47 = vmul.f32 %v542_v30, %v531_v42 }
  0xa7   : > { %659 = vmatpush1.bf16.msra.mxu1 %v519_v43  ;;  %1414 = vmatpush1.bf16.msra.mxu0 %v519_v43 }
  0xa8   : > { %v554_v51 = vpop.permute.xlu0 %553  ;;  %v550_v53 = vpack.c.bf16 %v548_v39, %v546_v47  ;;  %v549_v54 = vpack.c.bf16 %v547_v40, %v545_v46  ;;  %v2029_v11 = vpop.permute.xlu1 %585  ;;  %v944_v39 = vld [vmem:[%s2470_s5 + $0x8] sm:$0xff] }
  0xa9   : > { %v560_v58 = vsel %vm559_vm10, %v554_v51, %v558_v35  ;;  %v561_v59 = vsel %vm559_vm10, %v558_v35, %v554_v51  ;;  %v607_v24 = vmul.f32 %v598_v63, %v2029_v11  ;;  %v608_v25 = vmul.f32 %v602_v2, %v2029_v11  ;;  %v1710_v35 = vld [vmem:[%s2469_s4 + $0x4] ss:$12 sps:$4 sm:$0xff]   ;;  %v697_v40 = vld [vmem:[%s2466_s1] ss:$8 sm:$0x3] }
  0xaa   : > { %660 = vmatprep.subr.bf16.mxu1 %v550_v53  ;;  %1415 = vmatprep.subr.bf16.mxu0 %v550_v53  ;;  %v575_v4 = vmul.f32 %v568_v55, %v560_v58  ;;  %v576_v6 = vmul.f32 %v572_v56, %v561_v59  ;;  %v706_v46 = vrot.slane %v697_v40, %v1867_v15  ;;  %v1618_v47 = vld [vmem:[%s2466_s1 + $0x1] ss:$8 sm:$0x3] }
  0xab   : > { %661 = vmatpush1.bf16.msra.mxu1 %v549_v54  ;;  %1416 = vmatpush1.bf16.msra.mxu0 %v549_v54 }
  0xac   : > { %v2023_v62 = vpop.permute.xlu0 %555 }
  0xad   : > { %v577_v7 = vmul.f32 %v568_v55, %v2023_v62  ;;  %v578_v9 = vmul.f32 %v572_v56, %v2023_v62  ;;  %v732_v55 = vrot.slane %v1618_v47, %v1867_v15  ;;  %v1619_v56 = vld [vmem:[%s2466_s1 + $0x2] ss:$8 sm:$0x3] }
  0xaf   : > { %v580_v16 = vpack.c.bf16 %v578_v9, %v576_v6  ;;  %v579_v17 = vpack.c.bf16 %v577_v7, %v575_v4  ;;  %v754_v9 = vrot.slane %v1619_v56, %v1865_v14 }
  0xb0   : > { %v588_v21 = vpop.permute.xlu0 %587 }
  0xb1   : > { %v590_v3 = vsel %vm589_vm11, %v584_v50, %v588_v21  ;;  %v591_v27 = vsel %vm589_vm11, %v588_v21, %v584_v50  ;;  %662 = vmatprep.subr.bf16.mxu1 %v580_v16  ;;  %1417 = vmatprep.subr.bf16.mxu0 %v580_v16 }
  0xb2   : > { %v605_v29 = vmul.f32 %v598_v63, %v590_v3  ;;  %v606_v30 = vmul.f32 %v602_v2, %v591_v27  ;;  %663 = vmatpush1.bf16.msra.mxu1 %v579_v17  ;;  %1418 = vmatpush1.bf16.msra.mxu0 %v579_v17  ;;  %v712_v63 = vmul.f32 %v706_v46, %v1859_v10 }
  0xb3   : > { %v738_v27 = vmul.f32 %v732_v55, %v1861_v12 }
  0xb4   : > { %v610_v31 = vpack.c.bf16 %v608_v25, %v606_v30  ;;  %v609_v1 = vpack.c.bf16 %v607_v24, %v605_v29  ;;  %v758_v24 = vrot.slane %v1619_v56, %v1867_v15 }
  0xb6   : > { %664 = vmatprep.subr.bf16.mxu1 %v610_v31  ;;  %1419 = vmatprep.subr.bf16.mxu0 %v610_v31 }
  0xb7   : > { %665 = vmatpush1.bf16.msra.mxu1 %v609_v1  ;;  %1420 = vmatpush1.bf16.msra.mxu0 %v609_v1 }
  0xb8   : > { %974 = vmatprep.subr.bf16.mxu1 %v1887_v33 }
  0xba   : > { %681 = vmatmul.mubr.bf16.vlgmr.msra.gmra.mrb[0].mxu1 %v1615_v32  ;;  %v763_v32 = vmul.f32 %v754_v9, %v1924_v52 }
  0xbb   : > { %975 = vmatpush1.bf16.msra.mxu1 %v1889_v34  ;;  %1006 = vmatprep.mubr.bf16.mxu1 %v1710_v35 }
  0xbc   : > { %976 = vmatprep.subr.bf16.mxu1 %v1905_v44 }
  0xbf   : > { %977 = vmatpush1.bf16.msra.mxu1 %v1907_v45 }
  0xc0   : > { %978 = vmatprep.subr.bf16.mxu1 %v1931_v60 }
  0xc1   : > { %v636_v5 = vpop.permute.xlu0 %635 }
  0xc3   : > { %979 = vmatpush1.bf16.msra.mxu1 %v1933_v61 }
  0xc4   : > { %980 = vmatprep.subr.bf16.mxu1 %v1949_v18 }
  0xc7   : > { %981 = vmatpush1.bf16.msra.mxu1 %v1951_v19 }
  0xc8   : > { %1654 = vmatprep.subr.msk.bf16.mxu1 %vm1959_vm8, %v1955_v20 }
  0xcb   : > { %1657 = vmatpush1.bf16.msk.msra.mxu1 %vm1959_vm8, %v1977_v26 }
  0xcc   : > { %984 = vmatprep.subr.bf16.mxu1 %v2000_v37  ;;  %v1637_v37 = vcombine.high %v2089_v36, %v2089_v36 }
  0xce   : > { %1435 = vmatprep.mubr.bf16.mxu0 %v1637_v37 }
  0xcf   : > { %985 = vmatpush1.bf16.msra.mxu1 %v519_v43  ;;  %v702_v43 = vrot.slane %v697_v40, %v1865_v14 }
  0xd0   : > { %986 = vmatprep.subr.bf16.mxu1 %v550_v53 }
  0xd1   : > { %v711_v57 = vmul.f32 %v702_v43, %v1859_v10  ;;  %v1620_v10 = vld [vmem:[%s2466_s1 + $0x3] ss:$8 sm:$0x3] }
  0xd3   : > { %987 = vmatpush1.bf16.msra.mxu1 %v549_v54  ;;  %v728_v54 = vrot.slane %v1618_v47, %v1865_v14 }
  0xd4   : > { %988 = vmatprep.subr.bf16.mxu1 %v580_v16 }
  0xd5   : > { %v737_v16 = vmul.f32 %v728_v54, %v1861_v12 }
  0xd7   : > { %989 = vmatpush1.bf16.msra.mxu1 %v579_v17 }
  0xd8   : > { %990 = vmatprep.subr.bf16.mxu1 %v610_v31 }
  0xdb   : > { %991 = vmatpush1.bf16.msra.mxu1 %v609_v1  ;;  %v780_v1 = vrot.slane %v1620_v10, %v1865_v14 }
 0x18d   : > { %v682_v33 = vpop.f32.mrb[0].mxu1 }
 0x18e   : > { %v683_v34 = vadd.f32 %v682_v33, %v636_v5  ;;  %v684_v44 = vpop.f32.mrb[1].mxu1 }
 0x18f   : > { %v686_v45 = vpop.f32.mrb[2].mxu1  ;;  %v685_v61 = vadd.f32 %v684_v44, %v636_v5 }
 0x190   : > { %v2055_v60 = vmax.f32 %v683_v34, 0.0  ;;  %v687_v18 = vpop.f32.mrb[3].mxu1  ;;  %v784_v34 = vrot.slane %v1620_v10, %v1867_v15 }
 0x191   : > { %v2061_v19 = vmax.f32 %v685_v61, 0.0  ;;  %v764_v61 = vmul.f32 %v758_v24, %v1924_v52 }
 0x192   : > { %717 = vrot.lane.b32.xlu0 %v2055_v60, %s1726_s20  ;;  %691 = vrot.lane.b32.xlu1 %v2055_v60, %s1725_s15  ;;  %v790_v52 = vmul.f32 %v784_v34, %v1911_v48 }
 0x196   : > { %743 = vrot.lane.b32.xlu0 %v2055_v60, %s1727_s21  ;;  %693 = vrot.lane.b32.xlu1 %v2061_v19, %s1725_s15 }
 0x19a   : > { %769 = vrot.lane.b32.xlu0 %v2055_v60, %s1728_s22  ;;  %719 = vrot.lane.b32.xlu1 %v2061_v19, %s1726_s20 }
 0x19e   : > { %799 = vrot.lane.b32.xlu0 %v2055_v60, %s1729_s23  ;;  %745 = vrot.lane.b32.xlu1 %v2061_v19, %s1727_s21 }
 0x1a2   : > { %825 = vrot.lane.b32.xlu0 %v2055_v60, %s1730_s24  ;;  %771 = vrot.lane.b32.xlu1 %v2061_v19, %s1728_s22 }
 0x1a6   : > { %851 = vrot.lane.b32.xlu0 %v2055_v60, %s1731_s25  ;;  %801 = vrot.lane.b32.xlu1 %v2061_v19, %s1729_s23 }
 0x1aa   : > { %877 = vrot.lane.b32.xlu0 %v2055_v60, %s1732_s26  ;;  %827 = vrot.lane.b32.xlu1 %v2061_v19, %s1730_s24 }
 0x1ae   : > { %947 = vperm.xlu0 %1703, %v943_v38   ;;  %853 = vrot.lane.b32.xlu1 %v2061_v19, %s1731_s25  ;;  %v789_v38 = vmul.f32 %v780_v1, %v1911_v48  ;;  %v796_v48 = vpack.c.bf16 %v1724_v0, %v2061_v19 }
 0x1b2   : > { %879 = vrot.lane.b32.xlu1 %v2061_v19, %s1732_s26  ;;  %v1623_v19 = vld [vmem:[%s2466_s1 + $0x7] ss:$8 sm:$0x3] }
 0x1b3   : > { %v866_v10 = vrot.slane %v1623_v19, %v1867_v15 }
 0x1b6   : > { %952 = vperm.xlu1 %1704, %v944_v39  }
 0x204   : > { %v718_v41 = vpop.permute.xlu0 %717  ;;  %v692_v42 = vpop.permute.xlu1 %691 }
 0x208   : > { %v744_v49 = vpop.permute.xlu0 %743  ;;  %v694_v50 = vpop.permute.xlu1 %693 }
 0x209   : > { %v695_v51 = vsel %vm376_vm2, %v692_v42, %v694_v50  ;;  %v696_v53 = vsel %vm376_vm2, %v694_v50, %v692_v42 }
 0x20a   : > { %v709_v58 = vmul.f32 %v702_v43, %v696_v53  ;;  %v710_v59 = vmul.f32 %v706_v46, %v695_v51 }
 0x20c   : > { %v713_v2 = vpack.c.bf16 %v711_v57, %v709_v58  ;;  %v770_v4 = vpop.permute.xlu0 %769  ;;  %v720_v6 = vpop.permute.xlu1 %719  ;;  %v714_v7 = vpack.c.bf16 %v712_v63, %v710_v59 }
 0x20d   : > { %v721_v17 = vsel %vm405_vm3, %v718_v41, %v720_v6  ;;  %v722_v21 = vsel %vm405_vm3, %v720_v6, %v718_v41  ;;  %v1621_v41 = vld [vmem:[%s2466_s1 + $0x5] ss:$8 sm:$0x3]  ;;  %v795_v6 = vpack.c.bf16 %v1724_v0, %v2055_v60 }
 0x20e   : > { %v735_v25 = vmul.f32 %v728_v54, %v722_v21  ;;  %v736_v3 = vmul.f32 %v732_v55, %v721_v17  ;;  %992 = vmatprep.subr.bf16.mxu1 %v714_v7  ;;  %1421 = vmatprep.subr.bf16.mxu0 %v714_v7  ;;  %v1622_v54 = vld [vmem:[%s2466_s1 + $0x6] ss:$8 sm:$0x3]  ;;  %v810_v57 = vrot.slane %v1621_v41, %v1865_v14 }
 0x20f   : > { %993 = vmatpush1.bf16.msra.mxu1 %v713_v2  ;;  %1422 = vmatpush1.bf16.msra.mxu0 %v713_v2  ;;  %v840_v58 = vrot.slane %v1622_v54, %v1867_v15 }
 0x210   : > { %v739_v29 = vpack.c.bf16 %v737_v16, %v735_v25  ;;  %v746_v30 = vpop.permute.xlu1 %745  ;;  %v740_v31 = vpack.c.bf16 %v738_v27, %v736_v3  ;;  %v800_v44 = vpop.permute.xlu0 %799  ;;  %v819_v21 = vmul.f32 %v810_v57, %v1981_v28 }
 0x211   : > { %v747_v5 = vsel %vm435_vm4, %v744_v49, %v746_v30  ;;  %v748_v33 = vsel %vm435_vm4, %v746_v30, %v744_v49  ;;  %v814_v49 = vrot.slane %v1621_v41, %v1867_v15  ;;  %v846_v0 = vmul.f32 %v840_v58, %v1963_v23 }
 0x212   : > { %v761_v45 = vmul.f32 %v754_v9, %v748_v33  ;;  %v762_v12 = vmul.f32 %v758_v24, %v747_v5  ;;  %994 = vmatprep.subr.bf16.mxu1 %v740_v31  ;;  %1423 = vmatprep.subr.bf16.mxu0 %v740_v31  ;;  %v836_v24 = vrot.slane %v1622_v54, %v1865_v14 }
 0x213   : > { %995 = vmatpush1.bf16.msra.mxu1 %v739_v29  ;;  %1424 = vmatpush1.bf16.msra.mxu0 %v739_v29  ;;  %v820_v63 = vmul.f32 %v814_v49, %v1981_v28  ;;  %v1624_v28 = vld [vmem:[%s2466_s1 + $0x10] ss:$8 sm:$0x3] }
 0x214   : > { %v765_v18 = vpack.c.bf16 %v763_v32, %v761_v45  ;;  %v772_v35 = vpop.permute.xlu1 %771  ;;  %v766_v37 = vpack.c.bf16 %v764_v61, %v762_v12  ;;  %v826_v46 = vpop.permute.xlu0 %825  ;;  %v862_v32 = vrot.slane %v1623_v19, %v1865_v14  ;;  %v892_v33 = vrot.slane %v1624_v28, %v1867_v15 }
 0x215   : > { %v773_v39 = vsel %vm465_vm5, %v770_v4, %v772_v35  ;;  %v774_v40 = vsel %vm465_vm5, %v772_v35, %v770_v4 }
 0x216   : > { %v787_v42 = vmul.f32 %v780_v1, %v774_v40  ;;  %v788_v43 = vmul.f32 %v784_v34, %v773_v39  ;;  %996 = vmatprep.subr.bf16.mxu1 %v766_v37  ;;  %1425 = vmatprep.subr.bf16.mxu0 %v766_v37  ;;  %v845_v1 = vmul.f32 %v836_v24, %v1963_v23  ;;  %v1708_v37 = vld [vmem:[%s2469_s4] ss:$12 sps:$4 sm:$0xff]  }
 0x217   : > { %997 = vmatpush1.bf16.msra.mxu1 %v765_v18  ;;  %1426 = vmatpush1.bf16.msra.mxu0 %v765_v18  ;;  %v871_v39 = vmul.f32 %v862_v32, %v2023_v62  ;;  %v888_v40 = vrot.slane %v1624_v28, %v1865_v14  ;;  %v898_v41 = vmul.f32 %v892_v33, %v2029_v11 }
 0x218   : > { %v791_v47 = vpack.c.bf16 %v789_v38, %v787_v42  ;;  %v802_v50 = vpop.permute.xlu1 %801  ;;  %v792_v51 = vpack.c.bf16 %v790_v52, %v788_v43  ;;  %v852_v7 = vpop.permute.xlu0 %851  ;;  %v1636_v38 = vcombine.low %v2089_v36, %v2089_v36  ;;  %v1713_v36 = vld [vmem:[%s2469_s4 + $0x8] ss:$12 sps:$4 sm:$0xff]  }
 0x219   : > { %v804_v53 = vsel %vm499_vm6, %v802_v50, %v800_v44  ;;  %v803_v55 = vsel %vm499_vm6, %v800_v44, %v802_v50  ;;  %v872_v44 = vmul.f32 %v866_v10, %v2023_v62 }
 0x21a   : > { %v818_v56 = vmul.f32 %v814_v49, %v804_v53  ;;  %998 = vmatprep.subr.bf16.mxu1 %v792_v51  ;;  %1427 = vmatprep.subr.bf16.mxu0 %v792_v51  ;;  %v817_v2 = vmul.f32 %v810_v57, %v803_v55 }
 0x21b   : > { %999 = vmatpush1.bf16.msra.mxu1 %v791_v47  ;;  %1428 = vmatpush1.bf16.msra.mxu0 %v791_v47 }
 0x21c   : > { %1000 = vmatprep.subr.bf16.mxu1 %v796_v48  ;;  %1429 = vmatprep.subr.bf16.mxu0 %v796_v48  ;;  %v828_v59 = vpop.permute.xlu1 %827  ;;  %v822_v17 = vpack.c.bf16 %v820_v63, %v818_v56  ;;  %v821_v60 = vpack.c.bf16 %v819_v21, %v817_v2  ;;  %v878_v5 = vpop.permute.xlu0 %877  ;;  %v2290_v63 = vld [vmem:[%s2471_s6 + $0x8] sm:$0xff] }
 0x21d   : > { %v830_v4 = vsel %vm529_vm9, %v828_v59, %v826_v46  ;;  %v829_v9 = vsel %vm529_vm9, %v826_v46, %v828_v59  ;;  %v897_v46 = vmul.f32 %v888_v40, %v2029_v11  ;;  %v1485_v11 = vld [vmem:[%s2473_s8] sm:$0xf]  ;;  %v1639_v2 = vcombine.high %v2290_v63, %v2290_v63 }
 0x21e   : > { %v844_v16 = vmul.f32 %v840_v58, %v830_v4  ;;  %v843_v3 = vmul.f32 %v836_v24, %v829_v9  ;;  %v1380_v4 = vld [vmem:[%s2472_s7] sm:$0xff] }
 0x21f   : > { %1001 = vmatpush1.bf16.msra.mxu1 %v795_v6  ;;  %1430 = vmatpush1.bf16.msra.mxu0 %v795_v6  ;;  %v1488_v6 = vld [vmem:[%s2474_s9] sm:$0xff] }
 0x220   : > { %v854_v25 = vpop.permute.xlu1 %853  ;;  %1002 = vmatprep.subr.bf16.mxu1 %v822_v17  ;;  %1431 = vmatprep.subr.bf16.mxu0 %v822_v17  ;;  %v848_v31 = vpack.c.bf16 %v846_v0, %v844_v16  ;;  %v847_v45 = vpack.c.bf16 %v845_v1, %v843_v3  ;;  %v1076_v1 = vld [vmem:[%s2466_s1] ss:$8 sm:$0x3] }
 0x221   : > { %v856_v27 = vsel %vm559_vm10, %v854_v25, %v852_v7  ;;  %v855_v29 = vsel %vm559_vm10, %v852_v7, %v854_v25 }
 0x222   : > { %v870_v30 = vmul.f32 %v866_v10, %v856_v27  ;;  %v869_v12 = vmul.f32 %v862_v32, %v855_v29 }
 0x223   : > { %1003 = vmatpush1.bf16.msra.mxu1 %v821_v60  ;;  %1432 = vmatpush1.bf16.msra.mxu0 %v821_v60 }
 0x224   : > { %v880_v34 = vpop.permute.xlu1 %879  ;;  %1004 = vmatprep.subr.bf16.mxu1 %v848_v31  ;;  %1433 = vmatprep.subr.bf16.mxu0 %v848_v31  ;;  %v874_v35 = vpack.c.bf16 %v872_v44, %v870_v30  ;;  %v873_v42 = vpack.c.bf16 %v871_v39, %v869_v12  ;;  %v1629_v44 = vld [vmem:[%s2466_s1 + $0x1] ss:$8 sm:$0x3] }
 0x225   : > { %v882_v61 = vsel %vm589_vm11, %v880_v34, %v878_v5  ;;  %v881_v23 = vsel %vm589_vm11, %v878_v5, %v880_v34  ;;  %v1081_v5 = vrot.slane %v1076_v1, %v1865_v14 }
 0x226   : > { %v896_v18 = vmul.f32 %v892_v33, %v882_v61  ;;  %v895_v43 = vmul.f32 %v888_v40, %v881_v23  ;;  %v1085_v33 = vrot.slane %v1076_v1, %v1867_v15 }
 0x227   : > { %1005 = vmatpush1.bf16.msra.mxu1 %v847_v45  ;;  %1434 = vmatpush1.bf16.msra.mxu0 %v847_v45 }
 0x228   : > { %1017 = vmatprep.subr.bf16.mxu1 %v874_v35  ;;  %1444 = vmatprep.subr.bf16.mxu0 %v874_v35  ;;  %v900_v52 = vpack.c.bf16 %v898_v41, %v896_v18  ;;  %v899_v62 = vpack.c.bf16 %v897_v46, %v895_v43  ;;  %v1113_v35 = vrot.slane %v1629_v44, %v1865_v14  ;;  %v1630_v43 = vld [vmem:[%s2466_s1 + $0x2] ss:$8 sm:$0x3] }
 0x22a   : > { %1007 = vmatmul.mubr.bf16.vlgmr.msra.gmra.mrb[4].mxu1 %v1708_v37  ;;  %1436 = vmatmul.mubr.bf16.vlgmr.msra.gmra.mrb[0].mxu0 %v1636_v38  ;;  %v1117_v37 = vrot.slane %v1629_v44, %v1867_v15 }
 0x22b   : > { %1018 = vmatpush1.bf16.msra.mxu1 %v873_v42  ;;  %1445 = vmatpush1.bf16.msra.mxu0 %v873_v42 }
 0x22c   : > { %1019 = vmatprep.subr.bf16.mxu1 %v900_v52  ;;  %1446 = vmatprep.subr.bf16.mxu0 %v900_v52 }
 0x22d   : > { %1049 = vmatprep.mubr.bf16.mxu1 %v1733_v8  ;;  %v948_v47 = vpop.permute.xlu0 %947  ;;  %1640 = vmatprep.mubr.msk.bf16.mxu0 %vm1399_vm13, %v1639_v2 }
 0x22f   : > { %1020 = vmatpush1.bf16.msra.mxu1 %v899_v62  ;;  %1447 = vmatpush1.bf16.msra.mxu0 %v899_v62 }
 0x230   : > { %1666 = vmatprep.subr.msk.bf16.mxu1 %vm1959_vm8, %v1955_v20 }
 0x235   : > { %v953_v49 = vpop.permute.xlu1 %952 }
 0x236   : > { %1628 = vmatmul.mubr.msk.bf16.vlgmr.msra.gmra.mrb[4].mxu1 %vm970_vm12, %v1713_v36 }
 0x237   : > { %1669 = vmatpush1.bf16.msk.msra.mxu1 %vm1959_vm8, %v1977_v26  ;;  %1529 = vmatprep.mubr.bf16.mxu1 %v1733_v8 }
 0x23e   : > { %1641 = vmatmul.mubr.msk.bf16.vlgmr.msra.gmra.mrb[8].mxu1 %vm644_vm1, %v1485_v11 }
 0x309   : > { %v1051_v20 = vpop.f32.mrb[4].mxu1 }
 0x30a   : > { %v1670_v50 = vadd.f32 %v1051_v20, %v948_v47  ;;  %v1053_v51 = vpop.f32.mrb[5].mxu1 }
 0x30b   : > { %v1671_v53 = vadd.f32 %v1053_v51, %v948_v47  ;;  %v1055_v54 = vpop.f32.mrb[6].mxu1 }
 0x30c   : > { %v2219_v55 = vmax.f32 %v1670_v50, 0.0  ;;  %v1672_v56 = vadd.f32 %v1055_v54, %v953_v49  ;;  %v1057_v22 = vpop.f32.mrb[7].mxu1  ;;  %v1149_v50 = vrot.slane %v1630_v43, %v1867_v15 }
 0x30d   : > { %v1673_v26 = vadd.f32 %v1057_v22, %v953_v49  ;;  %v2225_v8 = vmax.f32 %v1671_v53, 0.0  ;;  %v1145_v49 = vrot.slane %v1630_v43, %v1865_v14 }
 0x30e   : > { %v2221_v48 = vmax.f32 %v1672_v56, 0.0  ;;  %1064 = vrot.lane.b32.xlu0 %v2219_v55, %s1725_s15 }
 0x30f   : > { %v2227_v57 = vmax.f32 %v1673_v26, 0.0  ;;  %v1631_v26 = vld [vmem:[%s2466_s1 + $0x3] ss:$8 sm:$0x3] }
 0x310   : > { %1066 = vrot.lane.b32.xlu1 %v2221_v48, %s1725_s15  ;;  %v1192_v58 = vpack.c.bf16 %v2221_v48, %v2219_v55 }
 0x311   : > { %v1193_v59 = vpack.c.bf16 %v2227_v57, %v2225_v8  ;;  %v2308_v19 = vpop.f32.mrb[8].mxu1 }
 0x312   : > { %1096 = vrot.lane.b32.xlu0 %v2219_v55, %s1726_s20  ;;  %v2310_v7 = vpop.f32.mrb[9].mxu1 }
 0x313   : > { %v1535_v9 = vpop.f32.mrb[10].mxu1 }
 0x314   : > { %1098 = vrot.lane.b32.xlu1 %v2221_v48, %s1726_s20  ;;  %v1536_v16 = vpop.f32.mrb[11].mxu1 }
 0x316   : > { %1128 = vrot.lane.b32.xlu0 %v2219_v55, %s1727_s21 }
 0x318   : > { %1130 = vrot.lane.b32.xlu1 %v2221_v48, %s1727_s21 }
 0x31a   : > { %1160 = vrot.lane.b32.xlu0 %v2219_v55, %s1728_s22 }
 0x31c   : > { %1162 = vrot.lane.b32.xlu1 %v2221_v48, %s1728_s22 }
 0x31e   : > { %1196 = vrot.lane.b32.xlu0 %v2219_v55, %s1729_s23 }
 0x320   : > { %1198 = vrot.lane.b32.xlu1 %v2221_v48, %s1729_s23 }
 0x322   : > { %1228 = vrot.lane.b32.xlu0 %v2219_v55, %s1730_s24 }
 0x324   : > { %1230 = vrot.lane.b32.xlu1 %v2221_v48, %s1730_s24 }
 0x326   : > { %1260 = vrot.lane.b32.xlu0 %v2219_v55, %s1731_s25 }
 0x328   : > { %1262 = vrot.lane.b32.xlu1 %v2221_v48, %s1731_s25 }
 0x32a   : > { %1068 = vrot.lane.b32.xlu0 %v2225_v8, %s1725_s15 }
 0x32c   : > { %1070 = vrot.lane.b32.xlu1 %v2227_v57, %s1725_s15 }
 0x32e   : > { %1100 = vrot.lane.b32.xlu0 %v2225_v8, %s1726_s20 }
 0x330   : > { %1102 = vrot.lane.b32.xlu1 %v2227_v57, %s1726_s20 }
 0x332   : > { %1132 = vrot.lane.b32.xlu0 %v2225_v8, %s1727_s21 }
 0x334   : > { %1134 = vrot.lane.b32.xlu1 %v2227_v57, %s1727_s21 }
 0x336   : > { %1164 = vrot.lane.b32.xlu0 %v2225_v8, %s1728_s22 }
 0x338   : > { %1166 = vrot.lane.b32.xlu1 %v2227_v57, %s1728_s22 }
 0x33a   : > { %1292 = vrot.lane.b32.xlu0 %v2219_v55, %s1732_s26 }
 0x33c   : > { %1294 = vrot.lane.b32.xlu1 %v2221_v48, %s1732_s26 }
 0x33e   : > { %1200 = vrot.lane.b32.xlu0 %v2225_v8, %s1729_s23 }
 0x340   : > { %1202 = vrot.lane.b32.xlu1 %v2227_v57, %s1729_s23  ;;  %s1645_s23 = sshll.u32 %s2479_s14, 4 }
 0x342   : > { %1232 = vrot.lane.b32.xlu0 %v2225_v8, %s1730_s24 }
 0x344   : > { %1234 = vrot.lane.b32.xlu1 %v2227_v57, %s1730_s24 }
 0x346   : > { %1264 = vrot.lane.b32.xlu0 %v2225_v8, %s1731_s25 }
 0x348   : > { %1266 = vrot.lane.b32.xlu1 %v2227_v57, %s1731_s25 }
 0x34a   : > { %1296 = vrot.lane.b32.xlu0 %v2225_v8, %s1732_s26  ;;  %v1634_v8 = vld [vmem:[%s2466_s1 + $0x7] ss:$8 sm:$0x3] }
 0x34c   : > { %1298 = vrot.lane.b32.xlu1 %v2227_v57, %s1732_s26  ;;  %s359_s26 = scalar_lea.vmem %s2475_s10, %s1645_s23 }
 0x34e   : > { %1383 = vperm.xlu0 %1703, %v1380_v4  }
 0x350   : > { %1491 = vperm.xlu1 %1704, %v1488_v6  }
 0x380   : > { %v1065_v17 = vpop.permute.xlu0 %1064 }
 0x382   : > { %v1067_v21 = vpop.permute.xlu1 %1066 }
 0x384   : > { %v1097_v24 = vpop.permute.xlu0 %1096 }
 0x386   : > { %v1099_v10 = vpop.permute.xlu1 %1098 }
 0x388   : > { %v1129_v25 = vpop.permute.xlu0 %1128 }
 0x38a   : > { %v1131_v0 = vpop.permute.xlu1 %1130 }
 0x38c   : > { %v1161_v60 = vpop.permute.xlu0 %1160 }
 0x38e   : > { %v2312_v3 = vpop.permute.xlu1 %1162 }
 0x390   : > { %v2314_v27 = vpop.permute.xlu0 %1196 }
 0x392   : > { %v2316_v28 = vpop.permute.xlu1 %1198 }
 0x394   : > { %v2318_v29 = vpop.permute.xlu0 %1228 }
 0x396   : > { %v2320_v30 = vpop.permute.xlu1 %1230 }
 0x398   : > { %v2322_v31 = vpop.permute.xlu0 %1260 }
 0x39a   : > { %v2327_v32 = vpop.permute.xlu1 %1262 }
 0x39c   : > { %v1069_v34 = vpop.permute.xlu0 %1068 }
 0x39d   : > { %v1072_v45 = vsel %vm376_vm2, %v1065_v17, %v1069_v34  ;;  %v1074_v12 = vsel %vm376_vm2, %v1069_v34, %v1065_v17 }
 0x39e   : > { %v1071_v61 = vpop.permute.xlu1 %1070  ;;  %v1088_v38 = vmul.f32 %v1081_v5, %v1074_v12  ;;  %v1089_v39 = vmul.f32 %v1085_v33, %v1072_v45 }
 0x39f   : > { %v1073_v23 = vsel %vm376_vm2, %v1067_v21, %v1071_v61  ;;  %v1075_v18 = vsel %vm376_vm2, %v1071_v61, %v1067_v21 }
 0x3a0   : > { %v1090_v40 = vmul.f32 %v1081_v5, %v1075_v18  ;;  %v1091_v41 = vmul.f32 %v1085_v33, %v1073_v23  ;;  %v1101_v42 = vpop.permute.xlu0 %1100 }
 0x3a1   : > { %v1104_v52 = vsel %vm405_vm3, %v1097_v24, %v1101_v42  ;;  %v1106_v46 = vsel %vm405_vm3, %v1101_v42, %v1097_v24  ;;  %v1177_v24 = vrot.slane %v1631_v26, %v1865_v14 }
 0x3a2   : > { %v1092_v62 = vpack.c.bf16 %v1090_v40, %v1088_v38  ;;  %v1103_v36 = vpop.permute.xlu1 %1102  ;;  %v1093_v11 = vpack.c.bf16 %v1091_v41, %v1089_v39  ;;  %v1120_v51 = vmul.f32 %v1113_v35, %v1106_v46  ;;  %v1121_v53 = vmul.f32 %v1117_v37, %v1104_v52 }
 0x3a3   : > { %v1105_v47 = vsel %vm405_vm3, %v1099_v10, %v1103_v36  ;;  %v1107_v20 = vsel %vm405_vm3, %v1103_v36, %v1099_v10  ;;  %v1181_v10 = vrot.slane %v1631_v26, %v1867_v15 }
 0x3a4   : > { %v1122_v54 = vmul.f32 %v1113_v35, %v1107_v20  ;;  %v1123_v56 = vmul.f32 %v1117_v37, %v1105_v47  ;;  %1448 = vmatprep.subr.bf16.mxu0 %v1093_v11  ;;  %v1133_v22 = vpop.permute.xlu0 %1132 }
 0x3a5   : > { %v1136_v2 = vsel %vm435_vm4, %v1129_v25, %v1133_v22  ;;  %v1138_v4 = vsel %vm435_vm4, %v1133_v22, %v1129_v25  ;;  %1449 = vmatpush1.bf16.msra.mxu0 %v1092_v62  ;;  %v1633_v62 = vld [vmem:[%s2466_s1 + $0x6] ss:$8 sm:$0x3] }
 0x3a6   : > { %v1124_v6 = vpack.c.bf16 %v1122_v54, %v1120_v51  ;;  %v1135_v9 = vpop.permute.xlu1 %1134  ;;  %v1125_v16 = vpack.c.bf16 %v1123_v56, %v1121_v53  ;;  %v1152_v1 = vmul.f32 %v1145_v49, %v1138_v4  ;;  %v1153_v5 = vmul.f32 %v1149_v50, %v1136_v2 }
 0x3a7   : > { %v1137_v17 = vsel %vm435_vm4, %v1131_v0, %v1135_v9  ;;  %v1139_v21 = vsel %vm435_vm4, %v1135_v9, %v1131_v0  ;;  %v1249_v51 = vrot.slane %v1633_v62, %v1867_v15  ;;  %v1277_v9 = vrot.slane %v1634_v8, %v1865_v14 }
 0x3a8   : > { %v1154_v33 = vmul.f32 %v1145_v49, %v1139_v21  ;;  %v1155_v34 = vmul.f32 %v1149_v50, %v1137_v17  ;;  %1450 = vmatprep.subr.bf16.mxu0 %v1125_v16  ;;  %v1165_v25 = vpop.permute.xlu0 %1164  ;;  %v1245_v50 = vrot.slane %v1633_v62, %v1865_v14  ;;  %v1281_v16 = vrot.slane %v1634_v8, %v1867_v15 }
 0x3a9   : > { %v1168_v44 = vsel %vm465_vm5, %v1161_v60, %v1165_v25  ;;  %v1170_v45 = vsel %vm465_vm5, %v1165_v25, %v1161_v60  ;;  %1451 = vmatpush1.bf16.msra.mxu0 %v1124_v6  ;;  %v1632_v60 = vld [vmem:[%s2466_s1 + $0x5] ss:$8 sm:$0x3] }
 0x3aa   : > { %v1156_v12 = vpack.c.bf16 %v1154_v33, %v1152_v1  ;;  %v1167_v61 = vpop.permute.xlu1 %1166  ;;  %v1157_v0 = vpack.c.bf16 %v1155_v34, %v1153_v5  ;;  %v1184_v35 = vmul.f32 %v1177_v24, %v1170_v45  ;;  %v1185_v37 = vmul.f32 %v1181_v10, %v1168_v44 }
 0x3ab   : > { %v1169_v23 = vsel %vm465_vm5, %v2312_v3, %v1167_v61  ;;  %v1171_v18 = vsel %vm465_vm5, %v1167_v61, %v2312_v3  ;;  %v1213_v52 = vrot.slane %v1632_v60, %v1865_v14  ;;  %v1217_v3 = vrot.slane %v1632_v60, %v1867_v15 }
 0x3ac   : > { %v1186_v38 = vmul.f32 %v1177_v24, %v1171_v18  ;;  %v1187_v39 = vmul.f32 %v1181_v10, %v1169_v23  ;;  %1452 = vmatprep.subr.bf16.mxu0 %v1157_v0  ;;  %v1293_v40 = vpop.permute.xlu0 %1292 }
 0x3ad   : > { %1453 = vmatpush1.bf16.msra.mxu0 %v1156_v12 }
 0x3ae   : > { %v1188_v41 = vpack.c.bf16 %v1186_v38, %v1184_v35  ;;  %v2383_v42 = vpop.permute.xlu1 %1294  ;;  %v1189_v43 = vpack.c.bf16 %v1187_v39, %v1185_v37 }
 0x3b0   : > { %1454 = vmatprep.subr.bf16.mxu0 %v1189_v43  ;;  %v1201_v46 = vpop.permute.xlu0 %1200 }
 0x3b1   : > { %v1204_v36 = vsel %vm499_vm6, %v2314_v27, %v1201_v46  ;;  %v1206_v11 = vsel %vm499_vm6, %v1201_v46, %v2314_v27  ;;  %1455 = vmatpush1.bf16.msra.mxu0 %v1188_v41 }
 0x3b2   : > { %v1203_v47 = vpop.permute.xlu1 %1202  ;;  %1456 = vmatprep.subr.bf16.mxu0 %v1193_v59  ;;  %v1220_v53 = vmul.f32 %v1213_v52, %v1204_v36  ;;  %v1221_v27 = vmul.f32 %v1217_v3, %v1206_v11 }
 0x3b3   : > { %v1205_v20 = vsel %vm499_vm6, %v2316_v28, %v1203_v47  ;;  %v1207_v49 = vsel %vm499_vm6, %v1203_v47, %v2316_v28 }
 0x3b4   : > { %v1222_v54 = vmul.f32 %v1213_v52, %v1205_v20  ;;  %v1223_v56 = vmul.f32 %v1217_v3, %v1207_v49  ;;  %v1233_v22 = vpop.permute.xlu0 %1232  ;;  %v1638_v52 = vcombine.low %v2290_v63, %v2290_v63 }
 0x3b5   : > { %v1236_v57 = vsel %vm529_vm9, %v2318_v29, %v1233_v22  ;;  %v1238_v59 = vsel %vm529_vm9, %v1233_v22, %v2318_v29  ;;  %1457 = vmatpush1.bf16.msra.mxu0 %v1192_v58  ;;  %v1635_v58 = vld [vmem:[%s2466_s1 + $0x10] ss:$8 sm:$0x3] }
 0x3b6   : > { %v1224_v28 = vpack.c.bf16 %v1222_v54, %v1220_v53  ;;  %v1235_v26 = vpop.permute.xlu1 %1234  ;;  %v1225_v2 = vpack.c.bf16 %v1223_v56, %v1221_v27  ;;  %v1252_v29 = vmul.f32 %v1245_v50, %v1236_v57  ;;  %v1253_v17 = vmul.f32 %v1249_v51, %v1238_v59 }
 0x3b7   : > { %v1237_v4 = vsel %vm529_vm9, %v2320_v30, %v1235_v26  ;;  %v1239_v6 = vsel %vm529_vm9, %v1235_v26, %v2320_v30  ;;  %v1309_v25 = vrot.slane %v1635_v58, %v1865_v14  ;;  %v1313_v44 = vrot.slane %v1635_v58, %v1867_v15 }
 0x3b8   : > { %v1254_v21 = vmul.f32 %v1245_v50, %v1237_v4  ;;  %v1255_v55 = vmul.f32 %v1249_v51, %v1239_v6  ;;  %v1265_v48 = vpop.permute.xlu0 %1264  ;;  %1458 = vmatprep.subr.bf16.mxu0 %v1225_v2 }
 0x3b9   : > { %v1268_v24 = vsel %vm559_vm10, %v2322_v31, %v1265_v48  ;;  %v1270_v30 = vsel %vm559_vm10, %v1265_v48, %v2322_v31  ;;  %1459 = vmatpush1.bf16.msra.mxu0 %v1224_v28 }
 0x3ba   : > { %v1256_v10 = vpack.c.bf16 %v1254_v21, %v1252_v29  ;;  %v1267_v1 = vpop.permute.xlu1 %1266  ;;  %v1257_v5 = vpack.c.bf16 %v1255_v55, %v1253_v17  ;;  %v1284_v45 = vmul.f32 %v1277_v9, %v1268_v24  ;;  %v1285_v12 = vmul.f32 %v1281_v16, %v1270_v30 }
 0x3bb   : > { %v1269_v33 = vsel %vm559_vm10, %v2327_v32, %v1267_v1  ;;  %v1271_v34 = vsel %vm559_vm10, %v1267_v1, %v2327_v32 }
 0x3bc   : > { %v1286_v61 = vmul.f32 %v1277_v9, %v1269_v33  ;;  %v1287_v31 = vmul.f32 %v1281_v16, %v1271_v34  ;;  %v1297_v0 = vpop.permute.xlu0 %1296  ;;  %1460 = vmatprep.subr.bf16.mxu0 %v1257_v5 }
 0x3bd   : > { %v1300_v23 = vsel %vm589_vm11, %v1293_v40, %v1297_v0  ;;  %v1302_v18 = vsel %vm589_vm11, %v1297_v0, %v1293_v40  ;;  %1461 = vmatpush1.bf16.msra.mxu0 %v1256_v10 }
 0x3be   : > { %v1288_v35 = vpack.c.bf16 %v1286_v61, %v1284_v45  ;;  %v1299_v37 = vpop.permute.xlu1 %1298  ;;  %v1289_v32 = vpack.c.bf16 %v1287_v31, %v1285_v12  ;;  %v1316_v38 = vmul.f32 %v1309_v25, %v1300_v23  ;;  %v1317_v39 = vmul.f32 %v1313_v44, %v1302_v18 }
 0x3bf   : > { %v1301_v14 = vsel %vm589_vm11, %v2383_v42, %v1299_v37  ;;  %v1303_v15 = vsel %vm589_vm11, %v1299_v37, %v2383_v42 }
 0x3c0   : > { %v1318_v60 = vmul.f32 %v1309_v25, %v1301_v14  ;;  %v1319_v41 = vmul.f32 %v1313_v44, %v1303_v15  ;;  %1462 = vmatprep.subr.bf16.mxu0 %v1289_v32 }
 0x3c1   : > { %1463 = vmatpush1.bf16.msra.mxu0 %v1288_v35 }
 0x3c2   : > { %v1320_v40 = vpack.c.bf16 %v1318_v60, %v1316_v38  ;;  %v1321_v43 = vpack.c.bf16 %v1319_v41, %v1317_v39 }
 0x3c4   : > { %1464 = vmatprep.subr.bf16.mxu0 %v1321_v43 }
 0x3c5   : > { %1465 = vmatpush1.bf16.msra.mxu0 %v1320_v40 }
 0x3c8   : > { %1477 = vmatmul.mubr.bf16.vlgmr.msra.gmra.mrb[0].mxu0 %v1638_v52 }
 0x3cd   : > { %v1384_v3 = vpop.permute.xlu0 %1383 }
 0x3cf   : > { %v1492_v46 = vpop.permute.xlu1 %1491 }
 0x3d0   : > { %v1532_v47 = vadd.f32 %v2308_v19, %v1492_v46  ;;  %v1534_v50 = vadd.f32 %v2310_v7, %v1492_v46 }
 0x49b   : > { %v1478_v62 = vpop.f32.mrb[0].mxu0 }
 0x49c   : > { %v1674_v13 = vadd.f32 %v1478_v62, %v1384_v3  ;;  %v1480_v42 = vpop.f32.mrb[1].mxu0 }
 0x49d   : > { %v1675_v36 = vadd.f32 %v1480_v42, %v1384_v3  ;;  %v1482_v11 = vpop.f32.mrb[2].mxu0 }
 0x49e   : > { %v1538_v20 = vmax.f32 %v1674_v13, 0.0  ;;  %v1483_v49 = vpop.f32.mrb[3].mxu0 }
 0x49f   : > { %v1539_v63 = vmax.f32 %v1675_v36, 0.0 }
 0x4a0   : > { %v1540_v51 = vadd.f32 %v1538_v20, %v1532_v47 }
 0x4a1   : > { %v1541_v53 = vadd.f32 %v1539_v63, %v1534_v50 }
 0x4a2   : > { %1542 = vst [vmem:[%s359_s26] sm:$0xff] %v1540_v51 }
 0x4a3   : > { %1543 = vst [vmem:[%s359_s26 + $0x8] sm:$0xff] %v1541_v53 }
 0x4a4 PF: > { %s20_s13 = sadd.s32 1, %s1722_s13  }
 0x4a5   : > { %p17_p4 = scmp.ge.s32.totalorder %s20_s13, 4  }
 0x4a7   :  { %19 = sbr.rel (!%p17_p4) target bundleno = 1 (0x1), region = 97 }

</bundles_post_ra>
